<compile_context>
chip_gen: v5e
topology: v5e:2x2
jax: 0.10.0
libtpu: 0.0.40
codegen_flags: <defaults>
</compile_context>

<pallas_src>
import functools

import jax
import jax.numpy as jnp
import numpy as np
from jax import lax
from jax.experimental import pallas as pl
from jax.experimental.pallas import tpu as pltpu

_MASK_VALUE = -1e30


# ---------------------------------------------------------------------------
# in-kernel math helpers
# ---------------------------------------------------------------------------
def _layer_norm(x, gamma, beta, eps=1e-5):
    mean = jnp.mean(x, axis=-1, keepdims=True)
    var = jnp.mean((x - mean) ** 2, axis=-1, keepdims=True)
    return (x - mean) * lax.rsqrt(var + eps) * gamma + beta


def _sdpa(qh, kh, vh, bias, *, kv_chunk, cdt):
    """Head-batched scaled-dot-product attention core.

    qh/kh/vh: (bh, t, d) in `cdt` (bh = heads * bt folded into one batch dim).
    bias    : optional (t, t) f32 additive mask (0 / -1e30 causal).
    Returns (bh, t, d) f32.  Keys/values are processed in chunks of
    `kv_chunk` with an online softmax so the live score tensor is bounded by
    (bh, t, kv_chunk) regardless of t (mandatory on v7x's 64 MiB VMEM at
    production sequence lengths).
    """
    bh, t, d = qh.shape
    kc = min(kv_chunk, t)
    n_chunks = (t + kc - 1) // kc

    if n_chunks == 1:  # single pass: no rescaling needed
        s = jnp.einsum("bqd,bkd->bqk", qh, kh,
                       preferred_element_type=jnp.float32)
        if bias is not None:
            s = s + bias
        s = s - jnp.max(s, axis=-1, keepdims=True)
        p = jnp.exp(s)
        p = p * pl.reciprocal(jnp.sum(p, axis=-1, keepdims=True), approx=True)
        return jnp.einsum("bqk,bkd->bqd", p.astype(cdt), vh,
                          preferred_element_type=jnp.float32)

    m = jnp.full((bh, t, 1), -jnp.inf, jnp.float32)
    l = jnp.zeros((bh, t, 1), jnp.float32)
    acc = jnp.zeros((bh, t, d), jnp.float32)
    for c in range(n_chunks):                     # static unroll
        lo = c * kc
        hi = min(t, lo + kc)
        s = jnp.einsum("bqd,bkd->bqk", qh, kh[:, lo:hi, :],
                       preferred_element_type=jnp.float32)
        if bias is not None:
            s = s + bias[:, lo:hi]
        m_new = jnp.maximum(m, jnp.max(s, axis=-1, keepdims=True))
        alpha = jnp.exp(m - m_new)
        p = jnp.exp(s - m_new)
        l = alpha * l + jnp.sum(p, axis=-1, keepdims=True)
        acc = alpha * acc + jnp.einsum("bqk,bkd->bqd", p.astype(cdt),
                                       vh[:, lo:hi, :],
                                       preferred_element_type=jnp.float32)
        m = m_new
    return acc * pl.reciprocal(l, approx=True)


def _mha(q2d, k2d, v2d, w_unify, b_unify, *, heads, bt, t, bias, q_scale,
         cdt, kv_chunk):
    """Multi-head attention + unify projection.

    q2d/k2d/v2d : (bt*t, K) f32 activations (batch folded into rows).
    w_unify     : (K, K) pre-transposed (in, out) unify weight, already in cdt.
    Heads are folded into the leading (batch) axis of ONE pair of batched
    einsums, and the unify projection is ONE full-depth-K matmul.  The head
    fold/unfold uses lane slices + leading-dim / lane-dim concatenation rather
    than minor-dim reshapes/transposes, which Mosaic only lowers cleanly when
    the head dim is lane-aligned.
    """
    K = q2d.shape[-1]
    D = K // heads
    if q_scale is not None:
        q2d = q2d * q_scale

    def fold_heads(x2d):                       # (bt*t, K) -> (heads*bt, t, D)
        return jnp.concatenate(
            [x2d[:, h * D:(h + 1) * D].reshape(bt, t, D) for h in range(heads)],
            axis=0)

    qh = fold_heads(q2d).astype(cdt)
    kh = fold_heads(k2d).astype(cdt)
    vh = fold_heads(v2d).astype(cdt)

    o = _sdpa(qh, kh, vh, bias, kv_chunk=kv_chunk, cdt=cdt)  # (heads*bt, t, D) f32

    # Re-assemble head outputs along lanes, then ONE unify matmul of depth K
    # (instead of `heads` depth-D matmuls accumulated with full-width VPU adds).
    o2d = jnp.concatenate(
        [o[h * bt:(h + 1) * bt].reshape(bt * t, D) for h in range(heads)],
        axis=-1)
    return jnp.dot(o2d.astype(cdt), w_unify,
                   preferred_element_type=jnp.float32) + b_unify


# ---------------------------------------------------------------------------
# Pallas kernel: a block of `bt` batch elements per grid step
# ---------------------------------------------------------------------------
def decoder_block_kernel(x_ref, ek_ref, ev_ref, bias_ref,
                         wqkv_ref, bqkv_ref,
                         wmu_ref, bmu_ref, wau_ref, bau_ref,
                         wf1_ref, bf1_ref, wf2_ref, bf2_ref,
                         n1g_ref, n1b_ref, n2g_ref, n2b_ref, n3g_ref, n3b_ref,
                         o_ref, *, heads, compute_dtype, kv_chunk, ffn_chunk):
    cdt = compute_dtype
    bt, t, k = x_ref.shape
    d = k // heads

    x = x_ref[...].reshape(bt * t, k)            # fold batch rows into M

    # fused Q/K/V projection: one (M,K)x(K,3K) MXU push instead of three.
    qkv = jnp.dot(x.astype(cdt), wqkv_ref[...],
                  preferred_element_type=jnp.float32) + bqkv_ref[...]
    queries = qkv[:, :k]            # query_linear(x)
    keys = qkv[:, k:2 * k]          # key_linear(x)  (pre-scaled by 1/sqrt(d))
    vals = qkv[:, 2 * k:]           # value_linear(x)

    causal_bias = bias_ref[...]     # (t, t) additive 0/-1e30 mask (wrapper-built)

    # masked_attention(keys, queries, vals, mask): `keys` is the query stream
    # (positional match to the torch call); its 1/sqrt(d) score scale was
    # folded into the fused weight in the wrapper, so q_scale=None here.
    res = _mha(keys, queries, vals, wmu_ref[...], bmu_ref[...],
               heads=heads, bt=bt, t=t, bias=causal_bias, q_scale=None,
               cdt=cdt, kv_chunk=kv_chunk)
    x1 = _layer_norm(x + res, n1g_ref[...], n1b_ref[...])

    # attention(x, enc_key, enc_val, None): x1 is the query stream; it also
    # feeds the residual, so the scale cannot be folded and is applied inside.
    ek = ek_ref[...].reshape(bt * t, k)
    ev = ev_ref[...].reshape(bt * t, k)
    res = _mha(x1, ek, ev, wau_ref[...], bau_ref[...],
               heads=heads, bt=bt, t=t, bias=None, q_scale=1.0 / (d ** 0.5),
               cdt=cdt, kv_chunk=kv_chunk)
    x2 = _layer_norm(res + x1, n2g_ref[...], n2b_ref[...])

    # fc: Linear(k, n*k) -> ReLU -> Linear(n*k, k), tiled over the hidden dim
    # so the (bt*t, n*k) intermediate is never fully live.
    # TODO(synk): on v7x, consider fp8 (with per-channel scales) for wf1/wf2.
    nk = wf1_ref.shape[1]
    fc = min(ffn_chunk, nk)
    n_f = (nk + fc - 1) // fc
    x2c = x2.astype(cdt)
    res = None
    for c in range(n_f):                          # static unroll
        lo = c * fc
        hi = min(nk, lo + fc)
        h = jnp.maximum(
            jnp.dot(x2c, wf1_ref[:, lo:hi],
                    preferred_element_type=jnp.float32) + bf1_ref[:, lo:hi],
            0.0)
        part = jnp.dot(h.astype(cdt), wf2_ref[lo:hi, :],
                       preferred_element_type=jnp.float32)
        res = part if res is None else res + part
    res = res + bf2_ref[...]
    out = _layer_norm(res + x2, n3g_ref[...], n3b_ref[...])

    o_ref[...] = out.reshape(bt, t, k).astype(o_ref.dtype)


# ---------------------------------------------------------------------------
# wrapper-side parameter preparation (one-time layout work, zero kernel cost)
# ---------------------------------------------------------------------------
def _prepare_params(p, heads, compute_dtype):
    K = p["qw"].shape[0]
    D = K // heads
    scale = 1.0 / (D ** 0.5)
    # Fused QKV weight, pre-transposed to (in, out).  The key_linear branch is
    # the QUERY stream of masked_attention, so it absorbs the 1/sqrt(D) scale
    # (pure constant fold: `keys` is only consumed by that attention).
    wqkv = jnp.concatenate([p["qw"].T, scale * p["kw"].T, p["vw"].T], axis=1)
    bqkv = jnp.concatenate([p["qb"], scale * p["kb"], p["vb"]], axis=1)

    mxu = lambda w: w.astype(compute_dtype)     # weights go to MXU operand dtype
    return [
        mxu(wqkv), bqkv.astype(jnp.float32),
        mxu(p["muw"].T), p["mub"],
        mxu(p["auw"].T), p["aub"],
        mxu(p["f1w"].T), p["f1b"],
        mxu(p["f2w"].T), p["f2b"],
        p["n1g"], p["n1b"], p["n2g"], p["n2b"], p["n3g"], p["n3b"],
    ]


# ---------------------------------------------------------------------------
# generation-aware VMEM budget + batch-block selection
# ---------------------------------------------------------------------------
def _tpu_vmem_and_cores():
    """Per-TensorCore VMEM bytes and TensorCores per chip."""
    vmem = 64 * 1024 * 1024        # conservative fallback (valid on every gen)
    try:
        info = pltpu.get_tpu_info()
        vmem = int(getattr(info, "vmem_capacity_bytes", vmem))
    except Exception:
        pass
    # v7x exposes 64 MiB per TC and has 2 TCs/chip; v5e/v6e: 128 MiB, 1 TC.
    cores = 2 if vmem <= 64 * 1024 * 1024 else 1
    return vmem, cores


def _pick_batch_block(B, T, K, nK, heads, cdt, kv_chunk, ffn_chunk, budget, cores):
    """Largest batch fold that fits the VMEM budget; on multi-TC chips prefer a
    grid length divisible by the core count so both TensorCores get work."""
    cb = jnp.dtype(cdt).itemsize
    # single-buffered weights + biases + causal bias, resident across all steps
    weights = (cb * (3 * K * K + 2 * K * K + 2 * K * nK)
               + 4 * (13 * K + nK) + 4 * T * T)

    def step_bytes(bt):
        rows = bt * T
        act = 4 * 2 * rows * K * 4                           # 3 in + 1 out, double-buffered f32
        qkv = rows * 3 * K * (4 + cb)                        # fused projection + cdt copies
        resid = 8 * rows * K * 4                             # x/x1/x2/residuals/attn slack
        scores = 2 * bt * heads * T * min(T, kv_chunk) * 4   # s + p per KV chunk
        ffn = 2 * rows * min(nK, ffn_chunk) * 4              # h chunk + relu copy
        return weights + act + qkv + resid + scores + ffn

    divisors = [d for d in range(1, B + 1) if B % d == 0]
    fits = [d for d in divisors if step_bytes(d) <= budget] or [1]
    best = max(fits)                                          # v5e/v6e: max bt, even grid=(1,)
    if cores > 1:                                             # v7x: balance the two TCs
        balanced = [d for d in fits
                    if (B // d) % cores == 0
                    and d * T >= min(128, (B * T) // cores)]
        if balanced:
            best = max(balanced)
    return best


def _const_spec(shape):
    """Constant-index (weight/bias) block: single-buffered to halve its VMEM."""
    if hasattr(pl, "Buffered"):
        try:
            return pl.BlockSpec(shape, lambda b: (0, 0),
                                pipeline_mode=pl.Buffered(1))
        except TypeError:
            pass
    return pl.BlockSpec(shape, lambda b: (0, 0))


# ---------------------------------------------------------------------------
# public wrapper
# ---------------------------------------------------------------------------
def decoder_block(x, enc_key, enc_val, params, *, heads,
                  compute_dtype=jnp.bfloat16, batch_block=None,
                  kv_chunk=512, ffn_chunk=512):
    B, T, K = x.shape
    nK = params["f1w"].shape[0]

    vmem_phys, cores = _tpu_vmem_and_cores()
    vmem_limit = int(vmem_phys * 0.75)           # ~48 MiB on v7x, ~96 MiB on v5e/v6e

    if batch_block is None:
        bt = _pick_batch_block(B, T, K, nK, heads, compute_dtype, kv_chunk,
                               ffn_chunk, int(vmem_limit * 0.85), cores)
    else:
        bt = batch_block
    assert B % bt == 0
    grid = (B // bt,)

    prepared = _prepare_params(params, heads, compute_dtype)

    # causal mask as an additive 0/-1e30 bias, built once on the host side.
    row = lax.broadcasted_iota(jnp.int32, (T, T), 0)
    col = lax.broadcasted_iota(jnp.int32, (T, T), 1)
    causal_bias = jnp.where(row >= col, jnp.float32(0.0),
                            jnp.float32(_MASK_VALUE))

    act_spec = pl.BlockSpec((bt, T, K), lambda b: (b, 0, 0))
    bias_spec = _const_spec((T, T))
    param_specs = [_const_spec(w.shape) for w in prepared]

    kernel = functools.partial(decoder_block_kernel, heads=heads,
                               compute_dtype=compute_dtype,
                               kv_chunk=kv_chunk, ffn_chunk=ffn_chunk)
    return pl.pallas_call(
        kernel,
        out_shape=jax.ShapeDtypeStruct((B, T, K), jnp.float32),
        grid_spec=pltpu.PrefetchScalarGridSpec(
            num_scalar_prefetch=0,
            grid=grid,
            in_specs=[act_spec, act_spec, act_spec, bias_spec] + param_specs,
            out_specs=act_spec),
        compiler_params=pltpu.CompilerParams(
            dimension_semantics=("parallel",),
            vmem_limit_bytes=vmem_limit),
    )(x, enc_key, enc_val, causal_bias, *prepared)


# ---------------------------------------------------------------------------
# deterministic parameter init (PyTorch conventions: W is (out,in), LN gamma=1)
# ---------------------------------------------------------------------------
def init_params(key, n, k):
    ks = jax.random.split(key, 8)
    lin = lambda kk, o, i: 0.02 * jax.random.normal(kk, (o, i), jnp.float32)
    nk = n * k
    return {
        "qw": lin(ks[0], k, k), "qb": jnp.zeros((1, k), jnp.float32),
        "kw": lin(ks[1], k, k), "kb": jnp.zeros((1, k), jnp.float32),
        "vw": lin(ks[2], k, k), "vb": jnp.zeros((1, k), jnp.float32),
        "muw": lin(ks[3], k, k), "mub": jnp.zeros((1, k), jnp.float32),
        "auw": lin(ks[4], k, k), "aub": jnp.zeros((1, k), jnp.float32),
        "f1w": lin(ks[5], nk, k), "f1b": jnp.zeros((1, nk), jnp.float32),
        "f2w": lin(ks[6], k, nk), "f2b": jnp.zeros((1, k), jnp.float32),
        "n1g": jnp.ones((1, k), jnp.float32), "n1b": jnp.zeros((1, k), jnp.float32),
        "n2g": jnp.ones((1, k), jnp.float32), "n2b": jnp.zeros((1, k), jnp.float32),
        "n3g": jnp.ones((1, k), jnp.float32), "n3b": jnp.zeros((1, k), jnp.float32),
    }


# ---------------------------------------------------------------------------
# pure-JAX reference: the ORIGINAL (unfused, unscaled-weight) math, to validate
# that every wrapper-side fold is semantics-preserving.
# ---------------------------------------------------------------------------
def _ref_mha(q_in, k_in, v_in, unify_w, unify_b, heads, mask=None):
    T, K = q_in.shape
    D = K // heads
    scale = 1.0 / (D ** 0.5)
    outs = []
    for h in range(heads):
        sl = slice(h * D, (h + 1) * D)
        qh, kh, vh = q_in[:, sl], k_in[:, sl], v_in[:, sl]
        s = (qh @ kh.T) * scale
        if mask is not None:
            s = jnp.where(mask, s, jnp.float32(_MASK_VALUE))
        s = s - jnp.max(s, axis=-1, keepdims=True)
        p = jnp.exp(s)
        p = p / jnp.sum(p, axis=-1, keepdims=True)
        outs.append(p @ vh)
    out = jnp.concatenate(outs, axis=-1)
    return out @ unify_w.T + unify_b


def ref_decoder_block(x, enc_key, enc_val, p, heads):
    def one(xb, ekb, evb):
        T = xb.shape[0]
        keys = xb @ p["kw"].T + p["kb"]
        queries = xb @ p["qw"].T + p["qb"]
        vals = xb @ p["vw"].T + p["vb"]
        causal = jnp.tril(jnp.ones((T, T), bool))
        res = _ref_mha(keys, queries, vals, p["muw"], p["mub"], heads, mask=causal)
        x1 = _layer_norm(xb + res, p["n1g"], p["n1b"])
        res = _ref_mha(x1, ekb, evb, p["auw"], p["aub"], heads, mask=None)
        x2 = _layer_norm(res + x1, p["n2g"], p["n2b"])
        h = jnp.maximum(x2 @ p["f1w"].T + p["f1b"], 0.0)
        res = h @ p["f2w"].T + p["f2b"]
        return _layer_norm(res + x2, p["n3g"], p["n3b"])
    return jax.vmap(one)(x, enc_key, enc_val)


if __name__ == "__main__":
    # DecoderBlock(n=2, k=32, vocab_size=100, seq_length=8, heads=4, layers=1)
    n, k, vocab_size, seq_length, heads, layers = 2, 32, 100, 8, 4, 1
    B = 2

    key = jax.random.PRNGKey(0)
    kx, kk_, kv, kp = jax.random.split(key, 4)
    x = jax.random.normal(kx, (B, seq_length, k), jnp.float32)
    enc_key = jax.random.normal(kk_, (B, seq_length, k), jnp.float32)
    enc_val = jax.random.normal(kv, (B, seq_length, k), jnp.float32)
    params = init_params(kp, n, k)

    ref = ref_decoder_block(x, enc_key, enc_val, params, heads)

    # default path: bf16 MXU operands, f32 accumulation / elementwise.
    out = jax.block_until_ready(decoder_block(x, enc_key, enc_val, params, heads=heads))
    assert out.shape == (B, seq_length, k)
    np.testing.assert_allclose(np.asarray(out), np.asarray(ref), atol=1e-1, rtol=1e-1)

    # f32 MXU operands: numerically faithful to the PyTorch module.
    out_f32 = jax.block_until_ready(
        decoder_block(x, enc_key, enc_val, params, heads=heads,
                      compute_dtype=jnp.float32))
    np.testing.assert_allclose(np.asarray(out_f32), np.asarray(ref), atol=5e-3, rtol=5e-3)

    # exercise the online-softmax KV chunking and FFN hidden-dim tiling paths.
    out_tiled = jax.block_until_ready(
        decoder_block(x, enc_key, enc_val, params, heads=heads,
                      compute_dtype=jnp.float32, kv_chunk=4, ffn_chunk=32))
    np.testing.assert_allclose(np.asarray(out_tiled), np.asarray(ref), atol=5e-3, rtol=5e-3)

    print("KERNEL_OK")
</pallas_src>

<mosaic_0001>
module attributes {stable_mosaic.version = 11 : i64} {
  func.func @decoder_block_kernel(%arg0: i32, %arg1: memref<1x8x32xf32, #tpu.memory_space<vmem>>, %arg2: memref<1x8x32xf32, #tpu.memory_space<vmem>>, %arg3: memref<1x8x32xf32, #tpu.memory_space<vmem>>, %arg4: memref<8x8xf32, #tpu.memory_space<vmem>>, %arg5: memref<32x96xbf16, #tpu.memory_space<vmem>>, %arg6: memref<1x96xf32, #tpu.memory_space<vmem>>, %arg7: memref<32x32xbf16, #tpu.memory_space<vmem>>, %arg8: memref<1x32xf32, #tpu.memory_space<vmem>>, %arg9: memref<32x32xbf16, #tpu.memory_space<vmem>>, %arg10: memref<1x32xf32, #tpu.memory_space<vmem>>, %arg11: memref<32x64xbf16, #tpu.memory_space<vmem>>, %arg12: memref<1x64xf32, #tpu.memory_space<vmem>>, %arg13: memref<64x32xbf16, #tpu.memory_space<vmem>>, %arg14: memref<1x32xf32, #tpu.memory_space<vmem>>, %arg15: memref<1x32xf32, #tpu.memory_space<vmem>>, %arg16: memref<1x32xf32, #tpu.memory_space<vmem>>, %arg17: memref<1x32xf32, #tpu.memory_space<vmem>>, %arg18: memref<1x32xf32, #tpu.memory_space<vmem>>, %arg19: memref<1x32xf32, #tpu.memory_space<vmem>>, %arg20: memref<1x32xf32, #tpu.memory_space<vmem>>, %arg21: memref<1x8x32xf32, #tpu.memory_space<vmem>>) attributes {dimension_semantics = [#tpu.dimension_semantics<parallel>], iteration_bounds = array<i64: 2>, scalar_prefetch = 0 : i64, scratch_operands = 0 : i64, tpu.core_type = #tpu.core_type<tc>, window_params = [{transform_indices = @transform_0, window_bounds = array<i64: 1, 8, 32>}, {transform_indices = @transform_1, window_bounds = array<i64: 1, 8, 32>}, {transform_indices = @transform_2, window_bounds = array<i64: 1, 8, 32>}, {pipeline_mode = #tpu.pipeline_mode<synchronous>, transform_indices = @transform_3, window_bounds = array<i64: 8, 8>}, {pipeline_mode = #tpu.pipeline_mode<synchronous>, transform_indices = @transform_4, window_bounds = array<i64: 32, 96>}, {pipeline_mode = #tpu.pipeline_mode<synchronous>, transform_indices = @transform_5, window_bounds = array<i64: 1, 96>}, {pipeline_mode = #tpu.pipeline_mode<synchronous>, transform_indices = @transform_6, window_bounds = array<i64: 32, 32>}, {pipeline_mode = #tpu.pipeline_mode<synchronous>, transform_indices = @transform_7, window_bounds = array<i64: 1, 32>}, {pipeline_mode = #tpu.pipeline_mode<synchronous>, transform_indices = @transform_8, window_bounds = array<i64: 32, 32>}, {pipeline_mode = #tpu.pipeline_mode<synchronous>, transform_indices = @transform_9, window_bounds = array<i64: 1, 32>}, {pipeline_mode = #tpu.pipeline_mode<synchronous>, transform_indices = @transform_10, window_bounds = array<i64: 32, 64>}, {pipeline_mode = #tpu.pipeline_mode<synchronous>, transform_indices = @transform_11, window_bounds = array<i64: 1, 64>}, {pipeline_mode = #tpu.pipeline_mode<synchronous>, transform_indices = @transform_12, window_bounds = array<i64: 64, 32>}, {pipeline_mode = #tpu.pipeline_mode<synchronous>, transform_indices = @transform_13, window_bounds = array<i64: 1, 32>}, {pipeline_mode = #tpu.pipeline_mode<synchronous>, transform_indices = @transform_14, window_bounds = array<i64: 1, 32>}, {pipeline_mode = #tpu.pipeline_mode<synchronous>, transform_indices = @transform_15, window_bounds = array<i64: 1, 32>}, {pipeline_mode = #tpu.pipeline_mode<synchronous>, transform_indices = @transform_16, window_bounds = array<i64: 1, 32>}, {pipeline_mode = #tpu.pipeline_mode<synchronous>, transform_indices = @transform_17, window_bounds = array<i64: 1, 32>}, {pipeline_mode = #tpu.pipeline_mode<synchronous>, transform_indices = @transform_18, window_bounds = array<i64: 1, 32>}, {pipeline_mode = #tpu.pipeline_mode<synchronous>, transform_indices = @transform_19, window_bounds = array<i64: 1, 32>}, {transform_indices = @transform_20, window_bounds = array<i64: 1, 8, 32>}]} {
    %c0 = arith.constant 0 : index
    %c0_0 = arith.constant 0 : index
    %c0_1 = arith.constant 0 : index
    %0 = vector.load %arg1[%c0, %c0_0, %c0_1] : memref<1x8x32xf32, #tpu.memory_space<vmem>>, vector<1x8x32xf32>
    %1 = vector.shape_cast %0 : vector<1x8x32xf32> to vector<8x32xf32>
    %2 = arith.truncf %1 : vector<8x32xf32> to vector<8x32xbf16>
    %c0_2 = arith.constant 0 : index
    %c0_3 = arith.constant 0 : index
    %3 = vector.load %arg5[%c0_2, %c0_3] : memref<32x96xbf16, #tpu.memory_space<vmem>>, vector<32x96xbf16>
    %cst = arith.constant dense<0.000000e+00> : vector<8x96xf32>
    %4 = tpu.matmul %2, %3, %cst {dimension_numbers = #tpu.dot_dimension_numbers<[1], [0], [0], [1], [0, 0, 1, 1], [], []>} : vector<8x32xbf16>, vector<32x96xbf16>, vector<8x96xf32> -> vector<8x96xf32>
    %c0_4 = arith.constant 0 : index
    %c0_5 = arith.constant 0 : index
    %5 = vector.load %arg6[%c0_4, %c0_5] : memref<1x96xf32, #tpu.memory_space<vmem>>, vector<1x96xf32>
    %6 = vector.broadcast %5 : vector<1x96xf32> to vector<8x96xf32>
    %7 = arith.addf %4, %6 : vector<8x96xf32>
    %8 = vector.extract_strided_slice %7 {offsets = [0, 0], sizes = [8, 32], strides = [1, 1]} : vector<8x96xf32> to vector<8x32xf32>
    %9 = vector.extract_strided_slice %7 {offsets = [0, 32], sizes = [8, 32], strides = [1, 1]} : vector<8x96xf32> to vector<8x32xf32>
    %10 = vector.extract_strided_slice %7 {offsets = [0, 64], sizes = [8, 32], strides = [1, 1]} : vector<8x96xf32> to vector<8x32xf32>
    %c0_6 = arith.constant 0 : index
    %c0_7 = arith.constant 0 : index
    %11 = vector.load %arg4[%c0_6, %c0_7] : memref<8x8xf32, #tpu.memory_space<vmem>>, vector<8x8xf32>
    %c0_8 = arith.constant 0 : index
    %c0_9 = arith.constant 0 : index
    %12 = vector.load %arg7[%c0_8, %c0_9] : memref<32x32xbf16, #tpu.memory_space<vmem>>, vector<32x32xbf16>
    %c0_10 = arith.constant 0 : index
    %c0_11 = arith.constant 0 : index
    %13 = vector.load %arg8[%c0_10, %c0_11] : memref<1x32xf32, #tpu.memory_space<vmem>>, vector<1x32xf32>
    %14 = vector.extract_strided_slice %9 {offsets = [0, 0], sizes = [8, 8], strides = [1, 1]} : vector<8x32xf32> to vector<8x8xf32>
    %15 = vector.shape_cast %14 : vector<8x8xf32> to vector<1x8x8xf32>
    %16 = vector.extract_strided_slice %9 {offsets = [0, 8], sizes = [8, 8], strides = [1, 1]} : vector<8x32xf32> to vector<8x8xf32>
    %17 = vector.shape_cast %16 : vector<8x8xf32> to vector<1x8x8xf32>
    %18 = vector.extract_strided_slice %9 {offsets = [0, 16], sizes = [8, 8], strides = [1, 1]} : vector<8x32xf32> to vector<8x8xf32>
    %19 = vector.shape_cast %18 : vector<8x8xf32> to vector<1x8x8xf32>
    %20 = vector.extract_strided_slice %9 {offsets = [0, 24], sizes = [8, 8], strides = [1, 1]} : vector<8x32xf32> to vector<8x8xf32>
    %21 = vector.shape_cast %20 : vector<8x8xf32> to vector<1x8x8xf32>
    %22 = tpu.concatenate %15, %17, %19, %21 in 0 : vector<1x8x8xf32>, vector<1x8x8xf32>, vector<1x8x8xf32>, vector<1x8x8xf32> -> vector<4x8x8xf32>
    %23 = arith.truncf %22 : vector<4x8x8xf32> to vector<4x8x8xbf16>
    %24 = vector.extract_strided_slice %8 {offsets = [0, 0], sizes = [8, 8], strides = [1, 1]} : vector<8x32xf32> to vector<8x8xf32>
    %25 = vector.shape_cast %24 : vector<8x8xf32> to vector<1x8x8xf32>
    %26 = vector.extract_strided_slice %8 {offsets = [0, 8], sizes = [8, 8], strides = [1, 1]} : vector<8x32xf32> to vector<8x8xf32>
    %27 = vector.shape_cast %26 : vector<8x8xf32> to vector<1x8x8xf32>
    %28 = vector.extract_strided_slice %8 {offsets = [0, 16], sizes = [8, 8], strides = [1, 1]} : vector<8x32xf32> to vector<8x8xf32>
    %29 = vector.shape_cast %28 : vector<8x8xf32> to vector<1x8x8xf32>
    %30 = vector.extract_strided_slice %8 {offsets = [0, 24], sizes = [8, 8], strides = [1, 1]} : vector<8x32xf32> to vector<8x8xf32>
    %31 = vector.shape_cast %30 : vector<8x8xf32> to vector<1x8x8xf32>
    %32 = tpu.concatenate %25, %27, %29, %31 in 0 : vector<1x8x8xf32>, vector<1x8x8xf32>, vector<1x8x8xf32>, vector<1x8x8xf32> -> vector<4x8x8xf32>
    %33 = arith.truncf %32 : vector<4x8x8xf32> to vector<4x8x8xbf16>
    %34 = vector.extract_strided_slice %10 {offsets = [0, 0], sizes = [8, 8], strides = [1, 1]} : vector<8x32xf32> to vector<8x8xf32>
    %35 = vector.shape_cast %34 : vector<8x8xf32> to vector<1x8x8xf32>
    %36 = vector.extract_strided_slice %10 {offsets = [0, 8], sizes = [8, 8], strides = [1, 1]} : vector<8x32xf32> to vector<8x8xf32>
    %37 = vector.shape_cast %36 : vector<8x8xf32> to vector<1x8x8xf32>
    %38 = vector.extract_strided_slice %10 {offsets = [0, 16], sizes = [8, 8], strides = [1, 1]} : vector<8x32xf32> to vector<8x8xf32>
    %39 = vector.shape_cast %38 : vector<8x8xf32> to vector<1x8x8xf32>
    %40 = vector.extract_strided_slice %10 {offsets = [0, 24], sizes = [8, 8], strides = [1, 1]} : vector<8x32xf32> to vector<8x8xf32>
    %41 = vector.shape_cast %40 : vector<8x8xf32> to vector<1x8x8xf32>
    %42 = tpu.concatenate %35, %37, %39, %41 in 0 : vector<1x8x8xf32>, vector<1x8x8xf32>, vector<1x8x8xf32>, vector<1x8x8xf32> -> vector<4x8x8xf32>
    %43 = arith.truncf %42 : vector<4x8x8xf32> to vector<4x8x8xbf16>
    "tpu.trace_start"() <{level = 10 : i32, message = "bqd,bkd->bqk"}> : () -> ()
    %cst_12 = arith.constant dense<0.000000e+00> : vector<4x8x8xf32>
    %44 = tpu.matmul %23, %33, %cst_12 {dimension_numbers = #tpu.dot_dimension_numbers<[2], [2], [1], [1], [0, 0, 0, 1, 1, 1], [0], [0]>} : vector<4x8x8xbf16>, vector<4x8x8xbf16>, vector<4x8x8xf32> -> vector<4x8x8xf32>
    "tpu.trace_stop"() : () -> ()
    %45 = vector.shape_cast %11 : vector<8x8xf32> to vector<1x8x8xf32>
    %46 = vector.broadcast %45 : vector<1x8x8xf32> to vector<4x8x8xf32>
    %47 = arith.addf %44, %46 : vector<4x8x8xf32>
    %cst_13 = arith.constant dense<0xFF800000> : vector<4x8xf32>
    %48 = vector.multi_reduction <maximumf>, %47, %cst_13 [2] : vector<4x8x8xf32> to vector<4x8xf32>
    %49 = vector.shape_cast %48 : vector<4x8xf32> to vector<4x8x1xf32>
    %50 = vector.broadcast %49 : vector<4x8x1xf32> to vector<4x8x8xf32>
    %51 = arith.subf %47, %50 : vector<4x8x8xf32>
    %52 = math.exp %51 : vector<4x8x8xf32>
    %cst_14 = arith.constant dense<0.000000e+00> : vector<4x8xf32>
    %53 = vector.multi_reduction <add>, %52, %cst_14 [2] : vector<4x8x8xf32> to vector<4x8xf32>
    %54 = vector.shape_cast %53 : vector<4x8xf32> to vector<4x8x1xf32>
    %55 = tpu.reciprocal %54 {approx = true} : vector<4x8x1xf32> -> vector<4x8x1xf32>
    %56 = vector.broadcast %55 : vector<4x8x1xf32> to vector<4x8x8xf32>
    %57 = arith.mulf %52, %56 : vector<4x8x8xf32>
    %58 = arith.truncf %57 : vector<4x8x8xf32> to vector<4x8x8xbf16>
    "tpu.trace_start"() <{level = 10 : i32, message = "bqk,bkd->bqd"}> : () -> ()
    %cst_15 = arith.constant dense<0.000000e+00> : vector<4x8x8xf32>
    %59 = tpu.matmul %58, %43, %cst_15 {dimension_numbers = #tpu.dot_dimension_numbers<[2], [1], [1], [2], [0, 0, 0, 1, 1, 2], [0], [0]>} : vector<4x8x8xbf16>, vector<4x8x8xbf16>, vector<4x8x8xf32> -> vector<4x8x8xf32>
    "tpu.trace_stop"() : () -> ()
    %60 = vector.extract_strided_slice %59 {offsets = [0, 0, 0], sizes = [1, 8, 8], strides = [1, 1, 1]} : vector<4x8x8xf32> to vector<1x8x8xf32>
    %61 = vector.shape_cast %60 : vector<1x8x8xf32> to vector<8x8xf32>
    %62 = vector.extract_strided_slice %59 {offsets = [1, 0, 0], sizes = [1, 8, 8], strides = [1, 1, 1]} : vector<4x8x8xf32> to vector<1x8x8xf32>
    %63 = vector.shape_cast %62 : vector<1x8x8xf32> to vector<8x8xf32>
    %64 = vector.extract_strided_slice %59 {offsets = [2, 0, 0], sizes = [1, 8, 8], strides = [1, 1, 1]} : vector<4x8x8xf32> to vector<1x8x8xf32>
    %65 = vector.shape_cast %64 : vector<1x8x8xf32> to vector<8x8xf32>
    %66 = vector.extract_strided_slice %59 {offsets = [3, 0, 0], sizes = [1, 8, 8], strides = [1, 1, 1]} : vector<4x8x8xf32> to vector<1x8x8xf32>
    %67 = vector.shape_cast %66 : vector<1x8x8xf32> to vector<8x8xf32>
    %68 = tpu.concatenate %61, %63, %65, %67 in 1 : vector<8x8xf32>, vector<8x8xf32>, vector<8x8xf32>, vector<8x8xf32> -> vector<8x32xf32>
    %69 = arith.truncf %68 : vector<8x32xf32> to vector<8x32xbf16>
    %cst_16 = arith.constant dense<0.000000e+00> : vector<8x32xf32>
    %70 = tpu.matmul %69, %12, %cst_16 {dimension_numbers = #tpu.dot_dimension_numbers<[1], [0], [0], [1], [0, 0, 1, 1], [], []>} : vector<8x32xbf16>, vector<32x32xbf16>, vector<8x32xf32> -> vector<8x32xf32>
    %71 = vector.broadcast %13 : vector<1x32xf32> to vector<8x32xf32>
    %72 = arith.addf %70, %71 : vector<8x32xf32>
    %73 = arith.addf %1, %72 : vector<8x32xf32>
    %c0_17 = arith.constant 0 : index
    %c0_18 = arith.constant 0 : index
    %74 = vector.load %arg15[%c0_17, %c0_18] : memref<1x32xf32, #tpu.memory_space<vmem>>, vector<1x32xf32>
    %c0_19 = arith.constant 0 : index
    %c0_20 = arith.constant 0 : index
    %75 = vector.load %arg16[%c0_19, %c0_20] : memref<1x32xf32, #tpu.memory_space<vmem>>, vector<1x32xf32>
    %cst_21 = arith.constant dense<0.000000e+00> : vector<8xf32>
    %76 = vector.multi_reduction <add>, %73, %cst_21 [1] : vector<8x32xf32> to vector<8xf32>
    %77 = vector.shape_cast %76 : vector<8xf32> to vector<8x1xf32>
    %cst_22 = arith.constant 3.200000e+01 : f32
    %78 = vector.broadcast %cst_22 : f32 to vector<8x1xf32>
    %79 = arith.divf %77, %78 : vector<8x1xf32>
    %80 = vector.broadcast %79 : vector<8x1xf32> to vector<8x32xf32>
    %81 = arith.subf %73, %80 : vector<8x32xf32>
    %82 = arith.mulf %81, %81 : vector<8x32xf32>
    %cst_23 = arith.constant dense<0.000000e+00> : vector<8xf32>
    %83 = vector.multi_reduction <add>, %82, %cst_23 [1] : vector<8x32xf32> to vector<8xf32>
    %84 = vector.shape_cast %83 : vector<8xf32> to vector<8x1xf32>
    %cst_24 = arith.constant 3.200000e+01 : f32
    %85 = vector.broadcast %cst_24 : f32 to vector<8x1xf32>
    %86 = arith.divf %84, %85 : vector<8x1xf32>
    %87 = vector.broadcast %79 : vector<8x1xf32> to vector<8x32xf32>
    %88 = arith.subf %73, %87 : vector<8x32xf32>
    %cst_25 = arith.constant 9.99999974E-6 : f32
    %89 = vector.broadcast %cst_25 : f32 to vector<8x1xf32>
    %90 = arith.addf %86, %89 : vector<8x1xf32>
    %91 = math.rsqrt %90 : vector<8x1xf32>
    %92 = vector.broadcast %91 : vector<8x1xf32> to vector<8x32xf32>
    %93 = arith.mulf %88, %92 : vector<8x32xf32>
    %94 = vector.broadcast %74 : vector<1x32xf32> to vector<8x32xf32>
    %95 = arith.mulf %93, %94 : vector<8x32xf32>
    %96 = vector.broadcast %75 : vector<1x32xf32> to vector<8x32xf32>
    %97 = arith.addf %95, %96 : vector<8x32xf32>
    %c0_26 = arith.constant 0 : index
    %c0_27 = arith.constant 0 : index
    %c0_28 = arith.constant 0 : index
    %98 = vector.load %arg2[%c0_26, %c0_27, %c0_28] : memref<1x8x32xf32, #tpu.memory_space<vmem>>, vector<1x8x32xf32>
    %99 = vector.shape_cast %98 : vector<1x8x32xf32> to vector<8x32xf32>
    %c0_29 = arith.constant 0 : index
    %c0_30 = arith.constant 0 : index
    %c0_31 = arith.constant 0 : index
    %100 = vector.load %arg3[%c0_29, %c0_30, %c0_31] : memref<1x8x32xf32, #tpu.memory_space<vmem>>, vector<1x8x32xf32>
    %101 = vector.shape_cast %100 : vector<1x8x32xf32> to vector<8x32xf32>
    %c0_32 = arith.constant 0 : index
    %c0_33 = arith.constant 0 : index
    %102 = vector.load %arg9[%c0_32, %c0_33] : memref<32x32xbf16, #tpu.memory_space<vmem>>, vector<32x32xbf16>
    %c0_34 = arith.constant 0 : index
    %c0_35 = arith.constant 0 : index
    %103 = vector.load %arg10[%c0_34, %c0_35] : memref<1x32xf32, #tpu.memory_space<vmem>>, vector<1x32xf32>
    %cst_36 = arith.constant 0.353553385 : f32
    %104 = vector.broadcast %cst_36 : f32 to vector<8x32xf32>
    %105 = arith.mulf %97, %104 : vector<8x32xf32>
    %106 = vector.extract_strided_slice %105 {offsets = [0, 0], sizes = [8, 8], strides = [1, 1]} : vector<8x32xf32> to vector<8x8xf32>
    %107 = vector.shape_cast %106 : vector<8x8xf32> to vector<1x8x8xf32>
    %108 = vector.extract_strided_slice %105 {offsets = [0, 8], sizes = [8, 8], strides = [1, 1]} : vector<8x32xf32> to vector<8x8xf32>
    %109 = vector.shape_cast %108 : vector<8x8xf32> to vector<1x8x8xf32>
    %110 = vector.extract_strided_slice %105 {offsets = [0, 16], sizes = [8, 8], strides = [1, 1]} : vector<8x32xf32> to vector<8x8xf32>
    %111 = vector.shape_cast %110 : vector<8x8xf32> to vector<1x8x8xf32>
    %112 = vector.extract_strided_slice %105 {offsets = [0, 24], sizes = [8, 8], strides = [1, 1]} : vector<8x32xf32> to vector<8x8xf32>
    %113 = vector.shape_cast %112 : vector<8x8xf32> to vector<1x8x8xf32>
    %114 = tpu.concatenate %107, %109, %111, %113 in 0 : vector<1x8x8xf32>, vector<1x8x8xf32>, vector<1x8x8xf32>, vector<1x8x8xf32> -> vector<4x8x8xf32>
    %115 = arith.truncf %114 : vector<4x8x8xf32> to vector<4x8x8xbf16>
    %116 = vector.extract_strided_slice %99 {offsets = [0, 0], sizes = [8, 8], strides = [1, 1]} : vector<8x32xf32> to vector<8x8xf32>
    %117 = vector.shape_cast %116 : vector<8x8xf32> to vector<1x8x8xf32>
    %118 = vector.extract_strided_slice %99 {offsets = [0, 8], sizes = [8, 8], strides = [1, 1]} : vector<8x32xf32> to vector<8x8xf32>
    %119 = vector.shape_cast %118 : vector<8x8xf32> to vector<1x8x8xf32>
    %120 = vector.extract_strided_slice %99 {offsets = [0, 16], sizes = [8, 8], strides = [1, 1]} : vector<8x32xf32> to vector<8x8xf32>
    %121 = vector.shape_cast %120 : vector<8x8xf32> to vector<1x8x8xf32>
    %122 = vector.extract_strided_slice %99 {offsets = [0, 24], sizes = [8, 8], strides = [1, 1]} : vector<8x32xf32> to vector<8x8xf32>
    %123 = vector.shape_cast %122 : vector<8x8xf32> to vector<1x8x8xf32>
    %124 = tpu.concatenate %117, %119, %121, %123 in 0 : vector<1x8x8xf32>, vector<1x8x8xf32>, vector<1x8x8xf32>, vector<1x8x8xf32> -> vector<4x8x8xf32>
    %125 = arith.truncf %124 : vector<4x8x8xf32> to vector<4x8x8xbf16>
    %126 = vector.extract_strided_slice %101 {offsets = [0, 0], sizes = [8, 8], strides = [1, 1]} : vector<8x32xf32> to vector<8x8xf32>
    %127 = vector.shape_cast %126 : vector<8x8xf32> to vector<1x8x8xf32>
    %128 = vector.extract_strided_slice %101 {offsets = [0, 8], sizes = [8, 8], strides = [1, 1]} : vector<8x32xf32> to vector<8x8xf32>
    %129 = vector.shape_cast %128 : vector<8x8xf32> to vector<1x8x8xf32>
    %130 = vector.extract_strided_slice %101 {offsets = [0, 16], sizes = [8, 8], strides = [1, 1]} : vector<8x32xf32> to vector<8x8xf32>
    %131 = vector.shape_cast %130 : vector<8x8xf32> to vector<1x8x8xf32>
    %132 = vector.extract_strided_slice %101 {offsets = [0, 24], sizes = [8, 8], strides = [1, 1]} : vector<8x32xf32> to vector<8x8xf32>
    %133 = vector.shape_cast %132 : vector<8x8xf32> to vector<1x8x8xf32>
    %134 = tpu.concatenate %127, %129, %131, %133 in 0 : vector<1x8x8xf32>, vector<1x8x8xf32>, vector<1x8x8xf32>, vector<1x8x8xf32> -> vector<4x8x8xf32>
    %135 = arith.truncf %134 : vector<4x8x8xf32> to vector<4x8x8xbf16>
    "tpu.trace_start"() <{level = 10 : i32, message = "bqd,bkd->bqk"}> : () -> ()
    %cst_37 = arith.constant dense<0.000000e+00> : vector<4x8x8xf32>
    %136 = tpu.matmul %115, %125, %cst_37 {dimension_numbers = #tpu.dot_dimension_numbers<[2], [2], [1], [1], [0, 0, 0, 1, 1, 1], [0], [0]>} : vector<4x8x8xbf16>, vector<4x8x8xbf16>, vector<4x8x8xf32> -> vector<4x8x8xf32>
    "tpu.trace_stop"() : () -> ()
    %cst_38 = arith.constant dense<0xFF800000> : vector<4x8xf32>
    %137 = vector.multi_reduction <maximumf>, %136, %cst_38 [2] : vector<4x8x8xf32> to vector<4x8xf32>
    %138 = vector.shape_cast %137 : vector<4x8xf32> to vector<4x8x1xf32>
    %139 = vector.broadcast %138 : vector<4x8x1xf32> to vector<4x8x8xf32>
    %140 = arith.subf %136, %139 : vector<4x8x8xf32>
    %141 = math.exp %140 : vector<4x8x8xf32>
    %cst_39 = arith.constant dense<0.000000e+00> : vector<4x8xf32>
    %142 = vector.multi_reduction <add>, %141, %cst_39 [2] : vector<4x8x8xf32> to vector<4x8xf32>
    %143 = vector.shape_cast %142 : vector<4x8xf32> to vector<4x8x1xf32>
    %144 = tpu.reciprocal %143 {approx = true} : vector<4x8x1xf32> -> vector<4x8x1xf32>
    %145 = vector.broadcast %144 : vector<4x8x1xf32> to vector<4x8x8xf32>
    %146 = arith.mulf %141, %145 : vector<4x8x8xf32>
    %147 = arith.truncf %146 : vector<4x8x8xf32> to vector<4x8x8xbf16>
    "tpu.trace_start"() <{level = 10 : i32, message = "bqk,bkd->bqd"}> : () -> ()
    %cst_40 = arith.constant dense<0.000000e+00> : vector<4x8x8xf32>
    %148 = tpu.matmul %147, %135, %cst_40 {dimension_numbers = #tpu.dot_dimension_numbers<[2], [1], [1], [2], [0, 0, 0, 1, 1, 2], [0], [0]>} : vector<4x8x8xbf16>, vector<4x8x8xbf16>, vector<4x8x8xf32> -> vector<4x8x8xf32>
    "tpu.trace_stop"() : () -> ()
    %149 = vector.extract_strided_slice %148 {offsets = [0, 0, 0], sizes = [1, 8, 8], strides = [1, 1, 1]} : vector<4x8x8xf32> to vector<1x8x8xf32>
    %150 = vector.shape_cast %149 : vector<1x8x8xf32> to vector<8x8xf32>
    %151 = vector.extract_strided_slice %148 {offsets = [1, 0, 0], sizes = [1, 8, 8], strides = [1, 1, 1]} : vector<4x8x8xf32> to vector<1x8x8xf32>
    %152 = vector.shape_cast %151 : vector<1x8x8xf32> to vector<8x8xf32>
    %153 = vector.extract_strided_slice %148 {offsets = [2, 0, 0], sizes = [1, 8, 8], strides = [1, 1, 1]} : vector<4x8x8xf32> to vector<1x8x8xf32>
    %154 = vector.shape_cast %153 : vector<1x8x8xf32> to vector<8x8xf32>
    %155 = vector.extract_strided_slice %148 {offsets = [3, 0, 0], sizes = [1, 8, 8], strides = [1, 1, 1]} : vector<4x8x8xf32> to vector<1x8x8xf32>
    %156 = vector.shape_cast %155 : vector<1x8x8xf32> to vector<8x8xf32>
    %157 = tpu.concatenate %150, %152, %154, %156 in 1 : vector<8x8xf32>, vector<8x8xf32>, vector<8x8xf32>, vector<8x8xf32> -> vector<8x32xf32>
    %158 = arith.truncf %157 : vector<8x32xf32> to vector<8x32xbf16>
    %cst_41 = arith.constant dense<0.000000e+00> : vector<8x32xf32>
    %159 = tpu.matmul %158, %102, %cst_41 {dimension_numbers = #tpu.dot_dimension_numbers<[1], [0], [0], [1], [0, 0, 1, 1], [], []>} : vector<8x32xbf16>, vector<32x32xbf16>, vector<8x32xf32> -> vector<8x32xf32>
    %160 = vector.broadcast %103 : vector<1x32xf32> to vector<8x32xf32>
    %161 = arith.addf %159, %160 : vector<8x32xf32>
    %162 = arith.addf %161, %97 : vector<8x32xf32>
    %c0_42 = arith.constant 0 : index
    %c0_43 = arith.constant 0 : index
    %163 = vector.load %arg17[%c0_42, %c0_43] : memref<1x32xf32, #tpu.memory_space<vmem>>, vector<1x32xf32>
    %c0_44 = arith.constant 0 : index
    %c0_45 = arith.constant 0 : index
    %164 = vector.load %arg18[%c0_44, %c0_45] : memref<1x32xf32, #tpu.memory_space<vmem>>, vector<1x32xf32>
    %cst_46 = arith.constant dense<0.000000e+00> : vector<8xf32>
    %165 = vector.multi_reduction <add>, %162, %cst_46 [1] : vector<8x32xf32> to vector<8xf32>
    %166 = vector.shape_cast %165 : vector<8xf32> to vector<8x1xf32>
    %cst_47 = arith.constant 3.200000e+01 : f32
    %167 = vector.broadcast %cst_47 : f32 to vector<8x1xf32>
    %168 = arith.divf %166, %167 : vector<8x1xf32>
    %169 = vector.broadcast %168 : vector<8x1xf32> to vector<8x32xf32>
    %170 = arith.subf %162, %169 : vector<8x32xf32>
    %171 = arith.mulf %170, %170 : vector<8x32xf32>
    %cst_48 = arith.constant dense<0.000000e+00> : vector<8xf32>
    %172 = vector.multi_reduction <add>, %171, %cst_48 [1] : vector<8x32xf32> to vector<8xf32>
    %173 = vector.shape_cast %172 : vector<8xf32> to vector<8x1xf32>
    %cst_49 = arith.constant 3.200000e+01 : f32
    %174 = vector.broadcast %cst_49 : f32 to vector<8x1xf32>
    %175 = arith.divf %173, %174 : vector<8x1xf32>
    %176 = vector.broadcast %168 : vector<8x1xf32> to vector<8x32xf32>
    %177 = arith.subf %162, %176 : vector<8x32xf32>
    %cst_50 = arith.constant 9.99999974E-6 : f32
    %178 = vector.broadcast %cst_50 : f32 to vector<8x1xf32>
    %179 = arith.addf %175, %178 : vector<8x1xf32>
    %180 = math.rsqrt %179 : vector<8x1xf32>
    %181 = vector.broadcast %180 : vector<8x1xf32> to vector<8x32xf32>
    %182 = arith.mulf %177, %181 : vector<8x32xf32>
    %183 = vector.broadcast %163 : vector<1x32xf32> to vector<8x32xf32>
    %184 = arith.mulf %182, %183 : vector<8x32xf32>
    %185 = vector.broadcast %164 : vector<1x32xf32> to vector<8x32xf32>
    %186 = arith.addf %184, %185 : vector<8x32xf32>
    %187 = arith.truncf %186 : vector<8x32xf32> to vector<8x32xbf16>
    %c0_51 = arith.constant 0 : index
    %c0_52 = arith.constant 0 : index
    %188 = vector.load %arg11[%c0_51, %c0_52] : memref<32x64xbf16, #tpu.memory_space<vmem>>, vector<32x64xbf16>
    %cst_53 = arith.constant dense<0.000000e+00> : vector<8x64xf32>
    %189 = tpu.matmul %187, %188, %cst_53 {dimension_numbers = #tpu.dot_dimension_numbers<[1], [0], [0], [1], [0, 0, 1, 1], [], []>} : vector<8x32xbf16>, vector<32x64xbf16>, vector<8x64xf32> -> vector<8x64xf32>
    %c0_54 = arith.constant 0 : index
    %c0_55 = arith.constant 0 : index
    %190 = vector.load %arg12[%c0_54, %c0_55] : memref<1x64xf32, #tpu.memory_space<vmem>>, vector<1x64xf32>
    %191 = vector.broadcast %190 : vector<1x64xf32> to vector<8x64xf32>
    %192 = arith.addf %189, %191 : vector<8x64xf32>
    %cst_56 = arith.constant 0.000000e+00 : f32
    %193 = vector.broadcast %cst_56 : f32 to vector<8x64xf32>
    %194 = arith.maximumf %192, %193 : vector<8x64xf32>
    %195 = arith.truncf %194 : vector<8x64xf32> to vector<8x64xbf16>
    %c0_57 = arith.constant 0 : index
    %c0_58 = arith.constant 0 : index
    %196 = vector.load %arg13[%c0_57, %c0_58] : memref<64x32xbf16, #tpu.memory_space<vmem>>, vector<64x32xbf16>
    %cst_59 = arith.constant dense<0.000000e+00> : vector<8x32xf32>
    %197 = tpu.matmul %195, %196, %cst_59 {dimension_numbers = #tpu.dot_dimension_numbers<[1], [0], [0], [1], [0, 0, 1, 1], [], []>} : vector<8x64xbf16>, vector<64x32xbf16>, vector<8x32xf32> -> vector<8x32xf32>
    %c0_60 = arith.constant 0 : index
    %c0_61 = arith.constant 0 : index
    %198 = vector.load %arg14[%c0_60, %c0_61] : memref<1x32xf32, #tpu.memory_space<vmem>>, vector<1x32xf32>
    %199 = vector.broadcast %198 : vector<1x32xf32> to vector<8x32xf32>
    %200 = arith.addf %197, %199 : vector<8x32xf32>
    %201 = arith.addf %200, %186 : vector<8x32xf32>
    %c0_62 = arith.constant 0 : index
    %c0_63 = arith.constant 0 : index
    %202 = vector.load %arg19[%c0_62, %c0_63] : memref<1x32xf32, #tpu.memory_space<vmem>>, vector<1x32xf32>
    %c0_64 = arith.constant 0 : index
    %c0_65 = arith.constant 0 : index
    %203 = vector.load %arg20[%c0_64, %c0_65] : memref<1x32xf32, #tpu.memory_space<vmem>>, vector<1x32xf32>
    %cst_66 = arith.constant dense<0.000000e+00> : vector<8xf32>
    %204 = vector.multi_reduction <add>, %201, %cst_66 [1] : vector<8x32xf32> to vector<8xf32>
    %205 = vector.shape_cast %204 : vector<8xf32> to vector<8x1xf32>
    %cst_67 = arith.constant 3.200000e+01 : f32
    %206 = vector.broadcast %cst_67 : f32 to vector<8x1xf32>
    %207 = arith.divf %205, %206 : vector<8x1xf32>
    %208 = vector.broadcast %207 : vector<8x1xf32> to vector<8x32xf32>
    %209 = arith.subf %201, %208 : vector<8x32xf32>
    %210 = arith.mulf %209, %209 : vector<8x32xf32>
    %cst_68 = arith.constant dense<0.000000e+00> : vector<8xf32>
    %211 = vector.multi_reduction <add>, %210, %cst_68 [1] : vector<8x32xf32> to vector<8xf32>
    %212 = vector.shape_cast %211 : vector<8xf32> to vector<8x1xf32>
    %cst_69 = arith.constant 3.200000e+01 : f32
    %213 = vector.broadcast %cst_69 : f32 to vector<8x1xf32>
    %214 = arith.divf %212, %213 : vector<8x1xf32>
    %215 = vector.broadcast %207 : vector<8x1xf32> to vector<8x32xf32>
    %216 = arith.subf %201, %215 : vector<8x32xf32>
    %cst_70 = arith.constant 9.99999974E-6 : f32
    %217 = vector.broadcast %cst_70 : f32 to vector<8x1xf32>
    %218 = arith.addf %214, %217 : vector<8x1xf32>
    %219 = math.rsqrt %218 : vector<8x1xf32>
    %220 = vector.broadcast %219 : vector<8x1xf32> to vector<8x32xf32>
    %221 = arith.mulf %216, %220 : vector<8x32xf32>
    %222 = vector.broadcast %202 : vector<1x32xf32> to vector<8x32xf32>
    %223 = arith.mulf %221, %222 : vector<8x32xf32>
    %224 = vector.broadcast %203 : vector<1x32xf32> to vector<8x32xf32>
    %225 = arith.addf %223, %224 : vector<8x32xf32>
    %226 = vector.shape_cast %225 : vector<8x32xf32> to vector<1x8x32xf32>
    %c0_71 = arith.constant 0 : index
    %c0_72 = arith.constant 0 : index
    %c0_73 = arith.constant 0 : index
    %227 = vector.load %arg21[%c0_71, %c0_72, %c0_73] : memref<1x8x32xf32, #tpu.memory_space<vmem>>, vector<1x8x32xf32>
    tpu.vector_store %arg21[%c0_71, %c0_72, %c0_73], %226 {strides = array<i32>} : memref<1x8x32xf32, #tpu.memory_space<vmem>>, vector<1x8x32xf32>,
    return
  }
  func.func @transform_0(%arg0: i32) -> (i32, i32, i32) {
    %c0_i32 = arith.constant 0 : i32
    %c0_i32_0 = arith.constant 0 : i32
    %c0_i32_1 = arith.constant 0 : i32
    return %arg0, %c0_i32, %c0_i32_0 : i32, i32, i32
  }
  func.func @transform_1(%arg0: i32) -> (i32, i32, i32) {
    %c0_i32 = arith.constant 0 : i32
    %c0_i32_0 = arith.constant 0 : i32
    %c0_i32_1 = arith.constant 0 : i32
    return %arg0, %c0_i32, %c0_i32_0 : i32, i32, i32
  }
  func.func @transform_2(%arg0: i32) -> (i32, i32, i32) {
    %c0_i32 = arith.constant 0 : i32
    %c0_i32_0 = arith.constant 0 : i32
    %c0_i32_1 = arith.constant 0 : i32
    return %arg0, %c0_i32, %c0_i32_0 : i32, i32, i32
  }
  func.func @transform_3(%arg0: i32) -> (i32, i32) {
    %c0_i32 = arith.constant 0 : i32
    %c0_i32_0 = arith.constant 0 : i32
    %c0_i32_1 = arith.constant 0 : i32
    return %c0_i32, %c0_i32_0 : i32, i32
  }
  func.func @transform_4(%arg0: i32) -> (i32, i32) {
    %c0_i32 = arith.constant 0 : i32
    %c0_i32_0 = arith.constant 0 : i32
    %c0_i32_1 = arith.constant 0 : i32
    return %c0_i32, %c0_i32_0 : i32, i32
  }
  func.func @transform_5(%arg0: i32) -> (i32, i32) {
    %c0_i32 = arith.constant 0 : i32
    %c0_i32_0 = arith.constant 0 : i32
    %c0_i32_1 = arith.constant 0 : i32
    return %c0_i32, %c0_i32_0 : i32, i32
  }
  func.func @transform_6(%arg0: i32) -> (i32, i32) {
    %c0_i32 = arith.constant 0 : i32
    %c0_i32_0 = arith.constant 0 : i32
    %c0_i32_1 = arith.constant 0 : i32
    return %c0_i32, %c0_i32_0 : i32, i32
  }
  func.func @transform_7(%arg0: i32) -> (i32, i32) {
    %c0_i32 = arith.constant 0 : i32
    %c0_i32_0 = arith.constant 0 : i32
    %c0_i32_1 = arith.constant 0 : i32
    return %c0_i32, %c0_i32_0 : i32, i32
  }
  func.func @transform_8(%arg0: i32) -> (i32, i32) {
    %c0_i32 = arith.constant 0 : i32
    %c0_i32_0 = arith.constant 0 : i32
    %c0_i32_1 = arith.constant 0 : i32
    return %c0_i32, %c0_i32_0 : i32, i32
  }
  func.func @transform_9(%arg0: i32) -> (i32, i32) {
    %c0_i32 = arith.constant 0 : i32
    %c0_i32_0 = arith.constant 0 : i32
    %c0_i32_1 = arith.constant 0 : i32
    return %c0_i32, %c0_i32_0 : i32, i32
  }
  func.func @transform_10(%arg0: i32) -> (i32, i32) {
    %c0_i32 = arith.constant 0 : i32
    %c0_i32_0 = arith.constant 0 : i32
    %c0_i32_1 = arith.constant 0 : i32
    return %c0_i32, %c0_i32_0 : i32, i32
  }
  func.func @transform_11(%arg0: i32) -> (i32, i32) {
    %c0_i32 = arith.constant 0 : i32
    %c0_i32_0 = arith.constant 0 : i32
    %c0_i32_1 = arith.constant 0 : i32
    return %c0_i32, %c0_i32_0 : i32, i32
  }
  func.func @transform_12(%arg0: i32) -> (i32, i32) {
    %c0_i32 = arith.constant 0 : i32
    %c0_i32_0 = arith.constant 0 : i32
    %c0_i32_1 = arith.constant 0 : i32
    return %c0_i32, %c0_i32_0 : i32, i32
  }
  func.func @transform_13(%arg0: i32) -> (i32, i32) {
    %c0_i32 = arith.constant 0 : i32
    %c0_i32_0 = arith.constant 0 : i32
    %c0_i32_1 = arith.constant 0 : i32
    return %c0_i32, %c0_i32_0 : i32, i32
  }
  func.func @transform_14(%arg0: i32) -> (i32, i32) {
    %c0_i32 = arith.constant 0 : i32
    %c0_i32_0 = arith.constant 0 : i32
    %c0_i32_1 = arith.constant 0 : i32
    return %c0_i32, %c0_i32_0 : i32, i32
  }
  func.func @transform_15(%arg0: i32) -> (i32, i32) {
    %c0_i32 = arith.constant 0 : i32
    %c0_i32_0 = arith.constant 0 : i32
    %c0_i32_1 = arith.constant 0 : i32
    return %c0_i32, %c0_i32_0 : i32, i32
  }
  func.func @transform_16(%arg0: i32) -> (i32, i32) {
    %c0_i32 = arith.constant 0 : i32
    %c0_i32_0 = arith.constant 0 : i32
    %c0_i32_1 = arith.constant 0 : i32
    return %c0_i32, %c0_i32_0 : i32, i32
  }
  func.func @transform_17(%arg0: i32) -> (i32, i32) {
    %c0_i32 = arith.constant 0 : i32
    %c0_i32_0 = arith.constant 0 : i32
    %c0_i32_1 = arith.constant 0 : i32
    return %c0_i32, %c0_i32_0 : i32, i32
  }
  func.func @transform_18(%arg0: i32) -> (i32, i32) {
    %c0_i32 = arith.constant 0 : i32
    %c0_i32_0 = arith.constant 0 : i32
    %c0_i32_1 = arith.constant 0 : i32
    return %c0_i32, %c0_i32_0 : i32, i32
  }
  func.func @transform_19(%arg0: i32) -> (i32, i32) {
    %c0_i32 = arith.constant 0 : i32
    %c0_i32_0 = arith.constant 0 : i32
    %c0_i32_1 = arith.constant 0 : i32
    return %c0_i32, %c0_i32_0 : i32, i32
  }
  func.func @transform_20(%arg0: i32) -> (i32, i32, i32) {
    %c0_i32 = arith.constant 0 : i32
    %c0_i32_0 = arith.constant 0 : i32
    %c0_i32_1 = arith.constant 0 : i32
    return %arg0, %c0_i32, %c0_i32_0 : i32, i32, i32
  }
}

</mosaic_0001>

<bundles_post_ra>
// kernel: tpu_custom_call.1
= control target key start
LH: loop header
LB: loop body
LE: loop exit
PB: predicated region body
PF: predicated region fallthrough
CT: control target
= control target key end

     0   :  { %s2627_s0 = inlined_call_operand.vmem [shape: f32[2,8,32], index: 0, kind: input, shape index: {}]   ;;  %s2628_s1 = inlined_call_operand.vmem [shape: f32[2,8,32], index: 1, kind: input, shape index: {}]   ;;  %s2629_s2 = inlined_call_operand.vmem [shape: f32[2,8,32], index: 2, kind: input, shape index: {}]   ;;  %s2630_s3 = inlined_call_operand.hbm [shape: f32[8,8], index: 3, kind: input, shape index: {}]   ;;  %s2631_s4 = inlined_call_operand.hbm [shape: bf16[32,96], index: 4, kind: input, shape index: {}]   ;;  %s2632_s5 = inlined_call_operand.vmem [shape: f32[1,96], index: 5, kind: input, shape index: {}]   ;;  %s2633_s6 = inlined_call_operand.hbm [shape: bf16[32,32], index: 6, kind: input, shape index: {}]   ;;  %s2634_s7 = inlined_call_operand.vmem [shape: f32[1,32], index: 7, kind: input, shape index: {}]   ;;  %s2635_s8 = inlined_call_operand.hbm [shape: bf16[32,32], index: 8, kind: input, shape index: {}]   ;;  %s2636_s9 = inlined_call_operand.vmem [shape: f32[1,32], index: 9, kind: input, shape index: {}]   ;;  %s2637_s10 = inlined_call_operand.hbm [shape: bf16[32,64], index: 10, kind: input, shape index: {}]   ;;  %s2638_s11 = inlined_call_operand.vmem [shape: f32[1,64], index: 11, kind: input, shape index: {}]   ;;  %s2639_s12 = inlined_call_operand.vmem [shape: bf16[64,32], index: 12, kind: input, shape index: {}]   ;;  %s2640_s13 = inlined_call_operand.vmem [shape: f32[1,32], index: 13, kind: input, shape index: {}]   ;;  %s2641_s14 = inlined_call_operand.vmem [shape: f32[1,32], index: 14, kind: input, shape index: {}]   ;;  %s2642_s15 = inlined_call_operand.vmem [shape: f32[1,32], index: 15, kind: input, shape index: {}]   ;;  %s2643_s16 = inlined_call_operand.vmem [shape: f32[1,32], index: 16, kind: input, shape index: {}]   ;;  %s2644_s17 = inlined_call_operand.vmem [shape: f32[1,32], index: 17, kind: input, shape index: {}]   ;;  %s2645_s18 = inlined_call_operand.vmem [shape: f32[1,32], index: 18, kind: input, shape index: {}]   ;;  %s2646_s19 = inlined_call_operand.vmem [shape: f32[1,32], index: 19, kind: input, shape index: {}]   ;;  %s2647_s20 = inlined_call_operand.hbm [shape: f32[2,8,32], index: 20, kind: output, shape index: {}]  }
   0x1   :  { %2658 = sst [smem:[#allocation24_spill]] %s2627_s0 }
   0x2   :  { %2659 = sst [smem:[#allocation25_spill]] %s2628_s1 }
   0x3   :  { %2660 = sst [smem:[#allocation26_spill]] %s2629_s2 }
   0x4   :  { %2661 = sst [smem:[#allocation27_spill]] %s2630_s3 }
   0x5   :  { %2662 = sst [smem:[#allocation28_spill]] %s2631_s4 }
   0x6   :  { %2663 = sst [smem:[#allocation29_spill]] %s2635_s8 }
   0x7   :  { %2664 = sst [smem:[#allocation30_spill]] %s2645_s18 }
   0x8   :  { %2665 = sst [smem:[#allocation31_spill]] %s2646_s19 }
   0x9   :  { %2666 = sst [smem:[#allocation32_spill]] %s2647_s20 }
   0xa   :  { %25 = vsyncpa [#allocation3], 0 }
   0xb   :  { %26 = vsyncpa [#allocation6], 0 }
   0xc   :  { %27 = vsyncpa [#allocation9], 0 }
   0xd   :  { %28 = vsyncpa [#allocation4], 0 }
   0xe   :  { %30 = vsyncpa [#allocation4 + $0x1], 0  ;;  %s2326_s1 = smov 0   ;;  %s2328_s22 = smov 0  }
   0xf   :  { %s2330_s23 = smov 0   ;;  %s2332_s24 = smov 0  }
  0x10 LB: > { %2667 = sst [smem:[#allocation16_spill]] %s2191_s1  ;;  %s2347_s2 = sadd.s32 4294967295, %s2203_s24   ;;  %s2203_s24 = sphi %s2332_s24, %s2694_s24   ;;  %s2199_s23 = sphi %s2330_s23, %s2697_s23   ;;  %s2195_s22 = sphi %s2328_s22, %s2696_s22   ;;  %s2191_s1 = sphi %s2326_s1, %s2695_s1  }
  0x11   : > { %2668 = sst [smem:[#allocation17_spill]] %s2195_s22  ;;  %s1724_s25 = sadd.s32 4294967294, %s2203_s24  }
  0x12   : > { %2669 = sst [smem:[#allocation18_spill]] %s2199_s23  ;;  %s2351_s3 = sadd.s32 1, %s2203_s24  }
  0x13   : > { %2670 = sst [smem:[#allocation19_spill]] %s2203_s24  ;;  %s478_s26 = sadd.s32 1, %s2199_s23 }
  0x14   : > { %2671 = sst [smem:[#allocation20_spill]] %s2351_s3  ;;  %s475_s27 = ssub.s32 %s2203_s24, %s2351_s3 }
  0x15   : > { %p488_p0 = scmp.ne.s32.totalorder %s2199_s23, %s2195_s22  ;;  %p476_p1 = scmp.eq.s32.totalorder %s475_s27, 0 }
  0x16   : > { %p489_p2 = scmp.eq.s32.totalorder %s2347_s2, 1  ;;  %p494_p3 = scmp.ne.s32.totalorder %s2195_s22, %s2191_s1 }
  0x17   : > { %p495_p4 = scmp.eq.s32.totalorder %s1724_s25, 1  ;;  %p1725_p7 = scmp.ge.s32.totalorder %s2203_s24, 1 }
  0x18   : > { %s2362_s28 = scalar_select %p476_p1, %s2199_s23, %s478_s26  }
  0x19   : > { %p2364_p5 = por %p489_p2, %p488_p0  ;;  %p2368_p6 = por %p495_p4, %p494_p3 }
  0x1a   : > { %2672 = sst [smem:[#allocation21_spill]] %s2362_s28  ;;  %p502_p8 = scmp.lt.s32.totalorder %s2203_s24, 3 }
  0x1b   : > { %s2673_s4 = scalar_select %p2364_p5, 1, 0 }
  0x1c   : > { %s2675_s29 = scalar_select %p2368_p6, 1, 0 }
  0x1d   : > { %2674 = sst [smem:[#allocation22_spill]] %s2673_s4  ;;  %p1869_p9 = scmp.eq.s32.totalorder %s2347_s2, 0 }
  0x1e   : > { %2676 = sst [smem:[#allocation23_spill]] %s2675_s29  ;;  %p2375_p10 = pnand %p1725_p7, %p502_p8 }
  0x1f   : > { %s2678_s25 = sld [smem:[#allocation28_spill]]  ;;  %s2205_s27 = smov [#allocation5]  }
  0x20   : > { %p1849_p11 = pneg %p2375_p10  ;;  %s527_s28 = sshll.u32 %s2205_s27, 4  ;;  %s528_s28 = int_to_ptr.vmem [resolvable:$true] %s527_s28 }
  0x21   : > { %s2680_s8 = sld [smem:[#allocation29_spill]]  ;;  %s2206_s0 = smov 64  }
  0x22   : > { %p2386_p12 = pnand %p1869_p9, %p1849_p11  ;;  %s2207_s21 = smov 4  }
  0x23   : > { %s2681_s4 = sld [smem:[#allocation27_spill]]  ;;  %s2209_s18 = smov [#allocation2]  }
  0x24   : > { %s516_s22 = sshll.u32 %s2209_s18, 4  ;;  %s576_s24 = sshll.u32 %s2637_s10, 4  ;;  %s517_s22 = int_to_ptr.vmem [resolvable:$true] %s516_s22  ;;  %s577_s24 = int_to_ptr.hbm [resolvable:$true] %s576_s24 }
  0x25   : > { %s525_s26 = sshll.u32 %s2678_s25, 4  ;;  %s2208_s25 = smov [#allocation8]   ;;  %s526_s26 = int_to_ptr.hbm [resolvable:$true] %s525_s26 }
  0x26   : > { %1855 = dma.hbm_to_vmem [thread:$0]  (!%p2386_p12), %s526_s26, 256, %s528_s28, [#allocation6], %s2206_s0, %s2206_s0, %s2207_s21  }
  0x27   : > { %s559_s1 = sshll.u32 %s2680_s8, 4  ;;  %s561_s27 = sshll.u32 %s2208_s25, 4  ;;  %s560_s1 = int_to_ptr.hbm [resolvable:$true] %s559_s1  ;;  %s562_s27 = int_to_ptr.vmem [resolvable:$true] %s561_s27 }
  0x28   : > { %1861 = dma.hbm_to_vmem [thread:$0]  (!%p2386_p12), %s560_s1, 256, %s562_s27, [#allocation9], %s2206_s0, %s2206_s0, %s2207_s21  }
  0x29   : > { %s514_s20 = sshll.u32 %s2681_s4, 4  ;;  %s542_s8 = sshll.u32 %s2633_s6, 4  ;;  %s515_s20 = int_to_ptr.hbm [resolvable:$true] %s514_s20  ;;  %s543_s8 = int_to_ptr.hbm [resolvable:$true] %s542_s8 }
  0x2a   : > { %1852 = dma.hbm_to_vmem [thread:$0]  (!%p2386_p12), %s515_s20, 128, %s517_s22, [#allocation3]  }
  0x2b   : > { %s2210_s28 = smov [#allocation7]   ;;  %s2211_s1 = smov [#allocation10]  }
  0x2c   : > { %s544_s26 = sshll.u32 %s2210_s28, 4  ;;  %s578_s4 = sshll.u32 %s2211_s1, 4  ;;  %s545_s26 = int_to_ptr.vmem [resolvable:$true] %s544_s26  ;;  %s579_s4 = int_to_ptr.vmem [resolvable:$true] %s578_s4 }
  0x2d   : > { %1858 = dma.hbm_to_vmem [thread:$0]  (!%p2386_p12), %s543_s8, 256, %s545_s26, [#allocation6], %s2206_s0, %s2206_s0, %s2207_s21  }
  0x2e   : > { %1864 = dma.hbm_to_vmem [thread:$0]  (!%p2386_p12), %s577_s24, 256, %s579_s4, [#allocation9], %s2206_s0, %s2206_s0, %s2207_s21  }
  0x2f   : > { %642 = sbr.rel (%p2375_p10) target bundleno = 3190 (0xc76), region = 100 }
  0x34   : > { %2174 = dma.done.wait (%p1869_p9), [#allocation3], 128  }
  0x35   : > { %2176 = vsyncadd (%p1869_p9), [#allocation3], 4294967168 }
  0x36   : > { %2178 = dma.done.wait (%p1869_p9), [#allocation6], 512  }
  0x37   : > { %2180 = vsyncadd (%p1869_p9), [#allocation6], 4294966784 }
  0x38   : > { %2182 = dma.done.wait (%p1869_p9), [#allocation9], 512  }
  0x39   : > { %2184 = vsyncadd (%p1869_p9), [#allocation9], 4294966784  ;;  %p728_p13 = scmp.lt.s32.totalorder %s2347_s2, 1  ;;  %s2682_s23 = sld [smem:[#allocation24_spill]]  ;;  %v1816_v0 = vld [vmem:[#allocation5 + $0x8] sm:$0xff]  ;;  %v1815_v1 = vld [vmem:[#allocation5] sm:$0xff] }
  0x3a   : > { %773 = vmatpush.bf16.msra.mxu0 %v1816_v0  ;;  %vm763_vm0 = vcmask 261120   ;;  %v1928_v4 = vld [vmem:[%s2632_s5] ss:$0 sm:$0xff]  ;;  %vm805_vm1 = vcmask 64512   ;;  %s2212_s27 = smov 104   ;;  %s2213_s3 = smov 120  }
  0x3b   : > { %s729_s8 = scalar_select %p728_p13, %s2347_s2, 1  ;;  %v780_v33 = vld [vmem:[#allocation2] sm:$0xff]  ;;  %vm950_vm2 = vcmask 1043456   ;;  %vm1043_vm3 = vcmask 130048   ;;  %vm1045_vm4 = vcmask 195584   ;;  %vm1524_vm12 = vcmask 523264  }
  0x3c   : > { %s2214_s29 = smov 112   ;;  %s2215_s28 = smov 96  }
  0x3d   : > { %s2428_s18 = sshll.u32 %s729_s8, 3  ;;  %s2216_s26 = smov 64  }
  0x3e   : > { %774 = vmatpush.bf16.msra.mxu0 %v1815_v1  ;;  %s2217_s25 = smov 16   ;;  %s2218_s19 = smov 8  }
  0x3f   : > { %s731_s30 = scalar_lea.vmem %s2682_s23, %s2428_s18  ;;  %s2219_s24 = smov 24  }
  0x40   : > { %v2434_v2 = vld [vmem:[%s731_s30] sm:$0xff]  ;;  %s2683_s22 = sld [smem:[#allocation25_spill]] }
  0x41   : > { %v742_v3 = vpack.c.bf16 %v2434_v2, %v2434_v2  ;;  %s2684_s4 = sld [smem:[#allocation26_spill]] }
  0x42   : > { %s2690_s1 = sld [smem:[#allocation31_spill]] }
  0x43   : > { %1750 = vmatmul.msk.bf16.vlgmr.msra.gmra.mxu0 %vm763_vm0, %v742_v3 }
  0x46   : > { %s735_s23 = scalar_lea.vmem %s2683_s22, %s2428_s18 }
  0x47   : > { %s739_s8 = scalar_lea.vmem %s2684_s4, %s2428_s18  ;;  %s2685_s18 = sld [smem:[#allocation17_spill]] }
  0xc0   : > { %v776_v5 = vpop.f32.mrf.mxu0 }
  0xc1   : > { %v777_v6 = vadd.f32 %v1928_v4, %v776_v5 }
  0xc3   : > { %793 = vrot.lane.b32.xlu1 %v777_v6, %s2212_s27  ;;  %787 = vrot.lane.b32.xlu0 %v777_v6, %s2213_s3  ;;  %v796_v7 = vpack.c.bf16 %v777_v6, %v777_v6 }
  0xc5   : > { %v810_v8 = vsel %vm805_vm1, %v796_v7, 0  ;;  %v801_v10 = vunpack.c.l.b16 %v796_v7 }
  0xc6   : > { %819 = vmatpush.bf16.xpose.msra.mxu1 %v810_v8 }
  0xc7   : > { %v2446_v11 = vpack.c.b16 %v801_v10, %v801_v10 }
  0xc8   : > { %v778_v9 = vpop.f32.mrf.mxu0 }
  0xcb   : > { %790 = vrot.lane.b32.xlu0 %v777_v6, %s2214_s29 }
  0xd3   : > { %803 = vrot.lane.b32.xlu0 %v2446_v11, %s2215_s28 }
 0x135   : > { %v794_v12 = vpop.permute.xlu1 %793  ;;  %v788_v13 = vpop.permute.xlu0 %787 }
 0x136   : > { %v799_v14 = vpack.c.bf16 %v794_v12, %v794_v12  ;;  %v797_v15 = vpack.c.bf16 %v788_v13, %v788_v13 }
 0x138   : > { %v826_v16 = vunpack.c.l.b16 %v797_v15  ;;  %v834_v17 = vsel %vm805_vm1, %v797_v15, 0  ;;  %v882_v18 = vsel %vm805_vm1, %v799_v14, 0  ;;  %v874_v26 = vunpack.c.l.b16 %v799_v14 }
 0x139   : > { %843 = vmatpush.bf16.xpose.msra.mxu2 %v834_v17  ;;  %891 = vmatpush.bf16.xpose.msrb.mxu0 %v882_v18 }
 0x13a   : > { %v2451_v19 = vpack.c.b16 %v826_v16, %v826_v16  ;;  %v875_v27 = vpack.c.b16 %v874_v26, %v874_v26 }
 0x13c   : > { %828 = vrot.lane.b32.xlu1 %v2451_v19, %s2215_s28 }
 0x13d   : > { %v791_v20 = vpop.permute.xlu0 %790 }
 0x13e   : > { %v798_v21 = vpack.c.bf16 %v791_v20, %v791_v20 }
 0x140   : > { %v858_v22 = vsel %vm805_vm1, %v798_v21, 0  ;;  %v850_v23 = vunpack.c.l.b16 %v798_v21 }
 0x141   : > { %867 = vmatpush.bf16.xpose.msra.mxu3 %v858_v22 }
 0x142   : > { %v851_v24 = vpack.c.b16 %v850_v23, %v850_v23 }
 0x144   : > { %852 = vrot.lane.b32.xlu2 %v851_v24, %s2215_s28 }
 0x145   : > { %v804_v25 = vpop.permute.xlu0 %803 }
 0x146   : > { %1751 = vmatmul.msk.bf16.vlgmr.msra.gmra.mxu1 %vm805_vm1, %v804_v25 }
 0x14c   : > { %876 = vrot.lane.b32.xlu2 %v875_v27, %s2215_s28 }
 0x19e   : > { %v853_v28 = vpop.permute.xlu2 %852 }
 0x19f   : > { %1753 = vmatmul.msk.bf16.vlgmr.msra.gmra.mxu3 %vm805_vm1, %v853_v28 }
 0x1a6   : > { %v877_v29 = vpop.permute.xlu2 %876 }
 0x1a7   : > { %1754 = vmatmul.msk.bf16.vlgmr.msrb.gmra.mxu0 %vm805_vm1, %v877_v29 }
 0x1ae   : > { %v829_v30 = vpop.permute.xlu1 %828 }
 0x1af   : > { %1752 = vmatmul.msk.bf16.vlgmr.msra.gmra.mxu2 %vm805_vm1, %v829_v30 }
 0x1c3   : > { %v821_v31 = vpop.f32.mrf.mxu1 }
 0x1c4   : > { %v822_v40 = vadd.f32 %v821_v31, %v780_v33 }
 0x1c6   : > { %v897_v43 = vsel %vm805_vm1, %v822_v40, -inf }
 0x1cb   : > { %v823_v32 = vpop.f32.mrf.mxu1 }
 0x222   : > { %v869_v34 = vpop.f32.mrf.mxu3 }
 0x223   : > { %v870_v35 = vadd.f32 %v869_v34, %v780_v33 }
 0x224   : > { %v893_v36 = vpop.f32.mrf.mxu0 }
 0x225   : > { %v894_v37 = vadd.f32 %v893_v36, %v780_v33  ;;  %v903_v38 = vsel %vm805_vm1, %v870_v35, -inf }
 0x226   : > { %904 = vmax.xlane.f32.xlu2 %v903_v38  ;;  %v1817_v38 = vld [vmem:[#allocation7] sm:$0xff] }
 0x227   : > { %v906_v39 = vsel %vm805_vm1, %v894_v37, -inf }
 0x228   : > { %907 = vmax.xlane.f32.xlu0 %v906_v39 }
 0x22a   : > { %v871_v41 = vpop.f32.mrf.mxu3 }
 0x22c   : > { %v895_v42 = vpop.f32.mrf.mxu0 }
 0x22e   : > { %898 = vmax.xlane.f32.xlu2 %v897_v43 }
 0x232   : > { %v845_v44 = vpop.f32.mrf.mxu2 }
 0x233   : > { %v846_v45 = vadd.f32 %v845_v44, %v780_v33 }
 0x235   : > { %v900_v46 = vsel %vm805_vm1, %v846_v45, -inf }
 0x236   : > { %901 = vmax.xlane.f32.xlu1 %v900_v46  ;;  %v1929_v46 = vld [vmem:[%s2634_s7] ss:$0 sm:$0xff] }
 0x23a   : > { %v847_v47 = vpop.f32.mrf.mxu2 }
 0x299   : > { %v905_v48 = vpop.xlane.xlu2 %904 }
 0x29a   : > { %v911_v49 = vsub.f32 %v870_v35, %v905_v48 }
 0x29b   : > { %v908_v50 = vpop.xlane.xlu0 %907 }
 0x29c   : > { %v917_v51 = vmul.f32 1.442695, %v911_v49  ;;  %v912_v52 = vsub.f32 %v894_v37, %v908_v50  ;;  %v1818_v37 = vld [vmem:[#allocation7 + $0x8] sm:$0xff] }
 0x29e   : > { %1939 = vpow2.f32 %v917_v51  ;;  %v919_v53 = vmul.f32 1.442695, %v912_v52  ;;  %v2220_v52 = vmov 32.0  }
 0x2a0   : > { %1941 = vpow2.f32 %v919_v53 }
 0x2a1   : > { %v899_v63 = vpop.xlane.xlu2 %898 }
 0x2a2   : > { %v909_v0 = vsub.f32 %v822_v40, %v899_v63  ;;  %v1119_v63 = vld [vmem:[%s735_s23] sm:$0xff]  ;;  %s2687_s23 = sld [smem:[#allocation32_spill]] }
 0x2a4   : > { %v1940_v54 = vpop.eup %1939  ;;  %v913_v1 = vmul.f32 1.442695, %v909_v0  ;;  %v1151_v0 = vpack.c.bf16 %v1119_v63, %v1119_v63 }
 0x2a5   : > { %v927_v55 = vsel %vm805_vm1, %v1940_v54, 0.0 }
 0x2a6   : > { %v1942_v56 = vpop.eup %1941  ;;  %928 = vadd.xlane.f32.xlu2 %v927_v55 }
 0x2a7   : > { %v930_v57 = vsel %vm805_vm1, %v1942_v56, 0.0 }
 0x2a8   : > { %931 = vadd.xlane.f32.xlu0 %v930_v57  ;;  %s2688_s30 = smov %s2687_s23 }
 0x2a9   : > { %v902_v58 = vpop.xlane.xlu1 %901 }
 0x2aa   : > { %v910_v59 = vsub.f32 %v846_v45, %v902_v58 }
 0x2ac   : > { %v915_v60 = vmul.f32 1.442695, %v910_v59 }
 0x2ae   : > { %1943 = vpow2.f32 %v915_v60 }
 0x2af   : > { %1945 = vpow2.f32 %v913_v1  ;;  %v1173_v1 = vsel %vm805_vm1, %v1151_v0, 0 }
 0x2b4   : > { %v1944_v61 = vpop.eup %1943 }
 0x2b5   : > { %v924_v62 = vsel %vm805_vm1, %v1944_v61, 0.0  ;;  %v1946_v3 = vpop.eup %1945 }
 0x2b6   : > { %925 = vadd.xlane.f32.xlu1 %v924_v62  ;;  %v921_v4 = vsel %vm805_vm1, %v1946_v3, 0.0 }
 0x2bc   : > { %1009 = vrot.lane.b32.xlu0 %v875_v27, %s2216_s26 }
 0x2be   : > { %988 = vrot.lane.b32.xlu2 %v851_v24, %s2216_s26 }
 0x2c4   : > { %945 = vrot.lane.b32.xlu0 %v2446_v11, %s2216_s26 }
 0x2cf   : > { %967 = vrot.lane.b32.xlu1 %v2451_v19, %s2216_s26 }
 0x2f9   : > { %922 = vadd.xlane.f32.xlu1 %v921_v4 }
 0x312   : > { %1142 = vrot.lane.b32.xlu1 %v1119_v63, %s2213_s3 }
 0x319   : > { %v929_v5 = vpop.xlane.xlu2 %928 }
 0x31a   : > { %1947 = vrcp.f32 %v929_v5  ;;  %1148 = vrot.lane.b32.xlu1 %v1119_v63, %s2212_s27 }
 0x31b   : > { %v932_v8 = vpop.xlane.xlu0 %931 }
 0x31c   : > { %1949 = vrcp.f32 %v932_v8 }
 0x320   : > { %v1948_v6 = vpop.eup %1947 }
 0x321   : > { %v939_v7 = vmul.f32 %v1948_v6, %v1940_v54  ;;  %v989_v9 = vpop.permute.xlu2 %988 }
 0x322   : > { %v994_v10 = vsel %vm950_vm2, %v989_v9, 0  ;;  %v1950_v12 = vpop.eup %1949 }
 0x323   : > { %1003 = vmatpush.bf16.msrb.mxu3 %v994_v10  ;;  %v943_v11 = vpack.c.bf16 %v939_v7, %v939_v7  ;;  %v940_v13 = vmul.f32 %v1950_v12, %v1942_v56  ;;  %v1930_v12 = vld [vmem:[%s2641_s14] ss:$0 sm:$0xff] }
 0x325   : > { %v944_v16 = vpack.c.bf16 %v940_v13, %v940_v13 }
 0x326   : > { %1757 = vmatmul.msk.bf16.vlgmr.msrb.gmra.mxu3 %vm805_vm1, %v943_v11 }
 0x329   : > { %v926_v17 = vpop.xlane.xlu1 %925 }
 0x32a   : > { %1951 = vrcp.f32 %v926_v17 }
 0x32e   : > { %v1010_v14 = vpop.permute.xlu0 %1009 }
 0x32f   : > { %v1015_v15 = vsel %vm950_vm2, %v1010_v14, 0 }
 0x330   : > { %1024 = vmatpush.bf16.msra.mxu0 %v1015_v15  ;;  %v1952_v20 = vpop.eup %1951  ;;  %v1931_v15 = vld [vmem:[%s2642_s15] ss:$0 sm:$0xff] }
 0x331   : > { %v938_v21 = vmul.f32 %v1952_v20, %v1944_v61 }
 0x333   : > { %1758 = vmatmul.msk.bf16.vlgmr.msra.gmra.mxu0 %vm805_vm1, %v944_v16  ;;  %v942_v24 = vpack.c.bf16 %v938_v21, %v938_v21 }
 0x336   : > { %v946_v18 = vpop.permute.xlu0 %945 }
 0x337   : > { %v952_v19 = vsel %vm950_vm2, %v946_v18, 0 }
 0x338   : > { %961 = vmatpush.bf16.msrb.mxu1 %v952_v19 }
 0x33c   : > { %1072 = vmatpush.bf16.msra.mxu1 %v1818_v37 }
 0x340   : > { %1073 = vmatpush.bf16.msra.mxu1 %v1817_v38 }
 0x341   : > { %v968_v22 = vpop.permute.xlu1 %967 }
 0x342   : > { %v973_v23 = vsel %vm950_vm2, %v968_v22, 0 }
 0x343   : > { %982 = vmatpush.bf16.msrb.mxu2 %v973_v23 }
 0x346   : > { %1756 = vmatmul.msk.bf16.vlgmr.msrb.gmra.mxu2 %vm805_vm1, %v942_v24 }
 0x347   : > { %1182 = vmatpush.bf16.xpose.msra.mxu2 %v1173_v1 }
 0x36c   : > { %v923_v25 = vpop.xlane.xlu1 %922 }
 0x36d   : > { %1953 = vrcp.f32 %v923_v25 }
 0x36e   : > { %1955 = vrcp.f32 %v2220_v52 }
 0x373   : > { %v1954_v26 = vpop.eup %1953 }
 0x374   : > { %v937_v27 = vmul.f32 %v1954_v26, %v1946_v3  ;;  %v1956_v53 = vpop.eup %1955 }
 0x375   : > { %v1086_v54 = vmul.f32 32.0, %v1956_v53  ;;  %vm1090_vm5 = vweird.f32 %v1956_v53 }
 0x376   : > { %v941_v28 = vpack.c.bf16 %v937_v27, %v937_v27 }
 0x377   : > { %v1087_v55 = vsub.f32 1.0, %v1086_v54 }
 0x378   : > { %1755 = vmatmul.msk.bf16.vlgmr.msrb.gmra.mxu1 %vm805_vm1, %v941_v28 }
 0x379   : > { %v1088_v56 = vmul.f32 %v1956_v53, %v1087_v55 }
 0x37b   : > { %v1089_v57 = vadd.f32 %v1956_v53, %v1088_v56 }
 0x37d   : > { %v2489_v58 = vsel %vm1090_vm5, %v1956_v53, %v1089_v57 }
 0x384   : > { %v1143_v23 = vpop.permute.xlu1 %1142 }
 0x385   : > { %v1152_v24 = vpack.c.bf16 %v1143_v23, %v1143_v23 }
 0x387   : > { %v1192_v25 = vsel %vm805_vm1, %v1152_v24, 0 }
 0x388   : > { %1201 = vmatpush.bf16.xpose.msra.mxu3 %v1192_v25 }
 0x38c   : > { %v1149_v26 = vpop.permute.xlu1 %1148 }
 0x38d   : > { %v1154_v27 = vpack.c.bf16 %v1149_v26, %v1149_v26 }
 0x38f   : > { %v1230_v28 = vsel %vm805_vm1, %v1154_v27, 0 }
 0x390   : > { %1239 = vmatpush.bf16.xpose.msrb.mxu1 %v1230_v28 }
 0x3a9   : > { %v1005_v29 = vpop.f32.mrf.mxu3 }
 0x3aa   : > { %1035 = vrot.lane.b32.xlu0 %v1005_v29, %s2217_s25 }
 0x3b0   : > { %v1026_v30 = vpop.f32.mrf.mxu0 }
 0x3b1   : > { %v1007_v31 = vpop.f32.mrf.mxu3 }
 0x3b8   : > { %v1028_v32 = vpop.f32.mrf.mxu0 }
 0x3c9   : > { %v984_v33 = vpop.f32.mrf.mxu2 }
 0x3ca   : > { %1031 = vrot.lane.b32.xlu2 %v984_v33, %s2218_s19 }
 0x3d1   : > { %v986_v34 = vpop.f32.mrf.mxu2 }
 0x3d2   : > { %1039 = vrot.lane.b32.xlu2 %v1026_v30, %s2219_s24 }
 0x3f5   : > { %v963_v35 = vpop.f32.mrf.mxu1 }
 0x3fd   : > { %v965_v36 = vpop.f32.mrf.mxu1 }
 0x41c   : > { %v1036_v41 = vpop.permute.xlu0 %1035 }
 0x424   : > { %v1032_v39 = vpop.permute.xlu2 %1031 }
 0x425   : > { %v1042_v40 = vsel %vm805_vm1, %v963_v35, %v1032_v39 }
 0x426   : > { %v1044_v43 = vsel %vm1043_vm3, %v1042_v40, %v1036_v41 }
 0x42c   : > { %v1040_v42 = vpop.permute.xlu2 %1039 }
 0x42d   : > { %v1046_v44 = vsel %vm1045_vm4, %v1044_v43, %v1040_v42 }
 0x42e   : > { %v1047_v45 = vpack.c.bf16 %v1046_v44, %v1046_v44 }
 0x430   : > { %1767 = vmatmul.msk.bf16.vlgmr.msra.gmra.mxu1 %vm763_vm0, %v1047_v45 }
 0x4ad   : > { %v1075_v47 = vpop.f32.mrf.mxu1 }
 0x4ae   : > { %v1076_v48 = vadd.f32 %v1929_v46, %v1075_v47  ;;  %v1120_v47 = vld [vmem:[%s739_s8] sm:$0xff] }
 0x4b0   : > { %v1079_v49 = vadd.f32 %v1076_v48, %v2434_v2 }
 0x4b2   : > { %v1082_v50 = vsel %vm763_vm0, %v1079_v49, 0.0 }
 0x4b3   : > { %1083 = vadd.xlane.f32.xlu0 %v1082_v50 }
 0x4b5   : > { %v1077_v51 = vpop.f32.mrf.mxu1 }
 0x526   : > { %v1084_v59 = vpop.xlane.xlu0 %1083 }
 0x527   : > { %v1092_v60 = vmul.f32 %v2489_v58, %v1084_v59 }
 0x529   : > { %v1093_v61 = vsub.f32 %v1079_v49, %v1092_v60 }
 0x52b   : > { %v1094_v2 = vmul.f32 %v1093_v61, %v1093_v61 }
 0x52d   : > { %v1095_v62 = vsel %vm763_vm0, %v1094_v2, 0.0 }
 0x52e   : > { %1096 = vadd.xlane.f32.xlu2 %v1095_v62 }
 0x546   : > { %1145 = vrot.lane.b32.xlu2 %v1119_v63, %s2214_s29 }
 0x5a1   : > { %v1097_v3 = vpop.xlane.xlu2 %1096 }
 0x5a2   : > { %v1098_v4 = vmul.f32 %v1097_v3, %v2489_v58 }
 0x5a4   : > { %v1099_v5 = vadd.f32 1e-05, %v1098_v4 }
 0x5a6   : > { %1957 = vrsqrt.f32 %v1099_v5  ;;  %vm1106_vm7 = vweird.f32 %v1099_v5 }
 0x5a9   : > { %v1146_v20 = vpop.permute.xlu2 %1145 }
 0x5aa   : > { %v1153_v21 = vpack.c.bf16 %v1146_v20, %v1146_v20 }
 0x5ac   : > { %v1958_v6 = vpop.eup %1957  ;;  %v1211_v22 = vsel %vm805_vm1, %v1153_v21, 0 }
 0x5ad   : > { %v1101_v7 = vmul.f32 %v1958_v6, %v1099_v5  ;;  %vm1107_vm6 = vweird.f32 %v1958_v6  ;;  %1220 = vmatpush.bf16.xpose.msrb.mxu0 %v1211_v22 }
 0x5ae   : > { %vm1108_vm8 = vmor %vm1106_vm7, %vm1107_vm6 }
 0x5af   : > { %v1102_v8 = vmul.f32 %v1958_v6, %v1101_v7 }
 0x5b1   : > { %v1103_v9 = vmul.f32 0.5, %v1102_v8  ;;  %v1165_v8 = vpack.c.bf16 %v1120_v47, %v1120_v47 }
 0x5b3   : > { %v1104_v10 = vsub.f32 1.5, %v1103_v9  ;;  %v1297_v9 = vsel %vm950_vm2, %v1165_v8, 0 }
 0x5b4   : > { %1306 = vmatpush.bf16.msrb.mxu2 %v1297_v9 }
 0x5b5   : > { %v1105_v11 = vmul.f32 %v1958_v6, %v1104_v10 }
 0x5b7   : > { %v1109_v13 = vsel %vm1108_vm8, %v1958_v6, %v1105_v11 }
 0x5b8   : > { %v1110_v14 = vmul.f32 %v1109_v13, %v1093_v61 }
 0x5ba   : > { %v1114_v16 = vmul.f32 %v1930_v12, %v1110_v14 }
 0x5bc   : > { %v2508_v17 = vadd.f32 %v1931_v15, %v1114_v16 }
 0x5be   : > { %v1126_v18 = vmul.f32 0.35355338, %v2508_v17 }
 0x5c0   : > { %1131 = vrot.lane.b32.xlu1 %v1126_v18, %s2214_s29  ;;  %1128 = vrot.lane.b32.xlu0 %v1126_v18, %s2213_s3  ;;  %v1137_v19 = vpack.c.bf16 %v1126_v18, %v1126_v18 }
 0x5c2   : > { %1768 = vmatmul.msk.bf16.vlgmr.msra.gmra.mxu2 %vm805_vm1, %v1137_v19 }
 0x5c8   : > { %1134 = vrot.lane.b32.xlu0 %v1126_v18, %s2212_s27 }
 0x632   : > { %v1132_v29 = vpop.permute.xlu1 %1131  ;;  %v1129_v30 = vpop.permute.xlu0 %1128 }
 0x633   : > { %v1139_v31 = vpack.c.bf16 %v1132_v29, %v1132_v29  ;;  %v1138_v32 = vpack.c.bf16 %v1129_v30, %v1129_v30 }
 0x635   : > { %1769 = vmatmul.msk.bf16.vlgmr.msra.gmra.mxu3 %vm805_vm1, %v1138_v32  ;;  %1770 = vmatmul.msk.bf16.vlgmr.msrb.gmra.mxu0 %vm805_vm1, %v1139_v31 }
 0x63a   : > { %v1135_v33 = vpop.permute.xlu0 %1134 }
 0x63b   : > { %v1140_v34 = vpack.c.bf16 %v1135_v33, %v1135_v33 }
 0x63d   : > { %1771 = vmatmul.msk.bf16.vlgmr.msrb.gmra.mxu1 %vm805_vm1, %v1140_v34 }
 0x645   : > { %v1184_v35 = vpop.f32.mrf.mxu2 }
 0x646   : > { %v1245_v45 = vsel %vm805_vm1, %v1184_v35, -inf }
 0x64d   : > { %v1186_v36 = vpop.f32.mrf.mxu2 }
 0x6b2   : > { %v1222_v37 = vpop.f32.mrf.mxu0 }
 0x6b3   : > { %v1251_v38 = vsel %vm805_vm1, %v1222_v37, -inf }
 0x6b4   : > { %1252 = vmax.xlane.f32.xlu2 %v1251_v38 }
 0x6b8   : > { %v1203_v39 = vpop.f32.mrf.mxu3 }
 0x6b9   : > { %v1248_v40 = vsel %vm805_vm1, %v1203_v39, -inf }
 0x6ba   : > { %1249 = vmax.xlane.f32.xlu1 %v1248_v40  ;;  %v1224_v41 = vpop.f32.mrf.mxu0  ;;  %v1241_v42 = vpop.f32.mrf.mxu1 }
 0x6bb   : > { %v1254_v43 = vsel %vm805_vm1, %v1241_v42, -inf  ;;  %v1820_v41 = vld [vmem:[#allocation8 + $0x8] sm:$0xff] }
 0x6bc   : > { %1255 = vmax.xlane.f32.xlu0 %v1254_v43  ;;  %1409 = vmatpush.bf16.msra.mxu2 %v1820_v41 }
 0x6c0   : > { %v1205_v44 = vpop.f32.mrf.mxu3 }
 0x6c2   : > { %v1243_v46 = vpop.f32.mrf.mxu1  ;;  %1246 = vmax.xlane.f32.xlu1 %v1245_v45 }
 0x6d0   : > { %1156 = vrot.lane.b32.xlu0 %v1120_v47, %s2213_s3 }
 0x727   : > { %v1253_v48 = vpop.xlane.xlu2 %1252 }
 0x728   : > { %v1259_v49 = vsub.f32 %v1222_v37, %v1253_v48 }
 0x72a   : > { %v1265_v50 = vmul.f32 1.442695, %v1259_v49 }
 0x72c   : > { %1959 = vpow2.f32 %v1265_v50  ;;  %v1932_v50 = vld [vmem:[%s2636_s9] ss:$0 sm:$0xff] }
 0x72d   : > { %v1250_v51 = vpop.xlane.xlu1 %1249 }
 0x72e   : > { %v1258_v54 = vsub.f32 %v1203_v39, %v1250_v51 }
 0x72f   : > { %v1256_v52 = vpop.xlane.xlu0 %1255 }
 0x730   : > { %v1260_v53 = vsub.f32 %v1241_v42, %v1256_v52  ;;  %v1263_v59 = vmul.f32 1.442695, %v1258_v54  ;;  %v1819_v42 = vld [vmem:[#allocation8] sm:$0xff] }
 0x731   : > { %1410 = vmatpush.bf16.msra.mxu2 %v1819_v42 }
 0x732   : > { %v1960_v55 = vpop.eup %1959  ;;  %v1267_v56 = vmul.f32 1.442695, %v1260_v53 }
 0x733   : > { %v1275_v57 = vsel %vm805_vm1, %v1960_v55, 0.0 }
 0x734   : > { %1961 = vpow2.f32 %v1267_v56  ;;  %1276 = vadd.xlane.f32.xlu1 %v1275_v57 }
 0x735   : > { %v1247_v60 = vpop.xlane.xlu1 %1246  ;;  %1963 = vpow2.f32 %v1263_v59 }
 0x736   : > { %v1257_v61 = vsub.f32 %v1184_v35, %v1247_v60 }
 0x738   : > { %v1261_v2 = vmul.f32 1.442695, %v1257_v61 }
 0x73a   : > { %v1962_v62 = vpop.eup %1961  ;;  %1965 = vpow2.f32 %v1261_v2  ;;  %v1822_v2 = vld [vmem:[#allocation10 + $0x8] sm:$0xff] }
 0x73b   : > { %v1278_v63 = vsel %vm805_vm1, %v1962_v62, 0.0  ;;  %v1964_v0 = vpop.eup %1963 }
 0x73c   : > { %1279 = vadd.xlane.f32.xlu2 %v1278_v63  ;;  %v1272_v4 = vsel %vm805_vm1, %v1964_v0, 0.0 }
 0x740   : > { %v1966_v1 = vpop.eup %1965 }
 0x741   : > { %v1269_v3 = vsel %vm805_vm1, %v1966_v1, 0.0 }
 0x742   : > { %1270 = vadd.xlane.f32.xlu0 %v1269_v3  ;;  %v1157_v5 = vpop.permute.xlu0 %1156 }
 0x743   : > { %v1166_v6 = vpack.c.bf16 %v1157_v5, %v1157_v5 }
 0x744   : > { %1273 = vadd.xlane.f32.xlu2 %v1272_v4 }
 0x745   : > { %v1316_v7 = vsel %vm950_vm2, %v1166_v6, 0 }
 0x746   : > { %1325 = vmatpush.bf16.msrb.mxu3 %v1316_v7 }
 0x74a   : > { %1479 = vmatpush.bf16.msra.mxu3 %v1822_v2 }
 0x74d   : > { %1159 = vrot.lane.b32.xlu1 %v1120_v47, %s2214_s29  ;;  %s1812_s29 = sshll.u32 %s2347_s2, 3 }
 0x74e   : > { %s1586_s0 = scalar_lea.hbm %s2687_s23, %s1812_s29 }
 0x74f   : > { %s1590_s8 = sshll.u32 %s1586_s0, 4  ;;  %s1591_s8 = int_to_ptr.hbm [resolvable:$true] %s1590_s8 }
 0x75c   : > { %1162 = vrot.lane.b32.xlu2 %v1120_v47, %s2212_s27  ;;  %s725_s27 = sand.u32 1, %s2685_s18  }
 0x75d   : > { %s1738_s3 = sshll.u32 %s725_s27, 3  ;;  %s1576_s18 = scalar_lea.sflag [#allocation4], %s725_s27 }
 0x75e   : > { %s727_s4 = scalar_lea.vmem [#allocation11], %s1738_s3  ;;  %s2149_s3 = scalar_lea.hbm %s2688_s30, 16 }
 0x75f   : > { %s1588_s2 = sshll.u32 %s727_s4, 4  ;;  %s1589_s2 = int_to_ptr.vmem [resolvable:$true] %s1588_s2 }
 0x7a7   : > { %v1277_v11 = vpop.xlane.xlu1 %1276 }
 0x7a8   : > { %1967 = vrcp.f32 %v1277_v11 }
 0x7ae   : > { %v1968_v14 = vpop.eup %1967 }
 0x7af   : > { %v1280_v10 = vpop.xlane.xlu2 %1279  ;;  %v1287_v24 = vmul.f32 %v1968_v14, %v1960_v55 }
 0x7b1   : > { %v1291_v31 = vpack.c.bf16 %v1287_v24, %v1287_v24 }
 0x7b5   : > { %v1271_v12 = vpop.xlane.xlu0 %1270 }
 0x7b6   : > { %1969 = vrcp.f32 %v1271_v12  ;;  %v1934_v12 = vld [vmem:[%s2644_s17] ss:$0 sm:$0xff] }
 0x7b7   : > { %1971 = vrcp.f32 %v1280_v10  ;;  %v1274_v13 = vpop.xlane.xlu2 %1273  ;;  %v1933_v10 = vld [vmem:[%s2643_s16] ss:$0 sm:$0xff] }
 0x7b8   : > { %1973 = vrcp.f32 %v1274_v13 }
 0x7bc   : > { %v1970_v15 = vpop.eup %1969 }
 0x7bd   : > { %v1972_v16 = vpop.eup %1971  ;;  %v1285_v18 = vmul.f32 %v1970_v15, %v1966_v1  ;;  %v1825_v1 = vld [vmem:[%s2639_s12 + $0x10] sm:$0xff] }
 0x7be   : > { %v1974_v19 = vpop.eup %1973  ;;  %v1288_v27 = vmul.f32 %v1972_v16, %v1962_v62  ;;  %v1821_v62 = vld [vmem:[#allocation10] sm:$0xff] }
 0x7bf   : > { %v1289_v20 = vpack.c.bf16 %v1285_v18, %v1285_v18  ;;  %v1286_v21 = vmul.f32 %v1974_v19, %v1964_v0  ;;  %v1160_v22 = vpop.permute.xlu1 %1159  ;;  %v1163_v23 = vpop.permute.xlu2 %1162  ;;  %1480 = vmatpush.bf16.msra.mxu3 %v1821_v62  ;;  %v1824_v18 = vld [vmem:[%s2639_s12 + $0x8] sm:$0xff]  ;;  %v1823_v19 = vld [vmem:[%s2639_s12] sm:$0xff] }
 0x7c0   : > { %v1167_v25 = vpack.c.bf16 %v1160_v22, %v1160_v22  ;;  %v1168_v26 = vpack.c.bf16 %v1163_v23, %v1163_v23  ;;  %v1292_v32 = vpack.c.bf16 %v1288_v27, %v1288_v27 }
 0x7c1   : > { %v1290_v28 = vpack.c.bf16 %v1286_v21, %v1286_v21  ;;  %1772 = vmatmul.msk.bf16.vlgmr.msrb.gmra.mxu2 %vm805_vm1, %v1289_v20  ;;  %v1935_v20 = vld [vmem:[%s2638_s11] ss:$0 sm:$0xff] }
 0x7c2   : > { %v1335_v29 = vsel %vm950_vm2, %v1167_v25, 0  ;;  %v1354_v30 = vsel %vm950_vm2, %v1168_v26, 0  ;;  %v1936_v26 = vld [vmem:[%s2640_s13] ss:$0 sm:$0xff] }
 0x7c3   : > { %1773 = vmatmul.msk.bf16.vlgmr.msrb.gmra.mxu3 %vm805_vm1, %v1290_v28  ;;  %1344 = vmatpush.bf16.msra.mxu0 %v1335_v29 }
 0x7c4   : > { %1363 = vmatpush.bf16.msra.mxu1 %v1354_v30 }
 0x7c6   : > { %1774 = vmatmul.msk.bf16.vlgmr.msra.gmra.mxu0 %vm805_vm1, %v1291_v31 }
 0x7c7   : > { %1775 = vmatmul.msk.bf16.vlgmr.msra.gmra.mxu1 %vm805_vm1, %v1292_v32 }
 0x843   : > { %v1346_v33 = vpop.f32.mrf.mxu0 }
 0x844   : > { %v1365_v34 = vpop.f32.mrf.mxu1  ;;  %v1308_v35 = vpop.f32.mrf.mxu2  ;;  %1374 = vrot.lane.b32.xlu2 %v1346_v33, %s2217_s25  ;;  %s2143_s25 = sshra.s32 %s1591_s8, 4  ;;  %s2144_s25 = int_to_ptr.hbm [resolvable:$true] %s2143_s25 }
 0x845   : > { %s2145_s29 = scalar_lea.hbm %s2144_s25, 8  ;;  %p2150_p3 = scmp.lt.s32.totalorder %s2144_s25, %s2688_s30 }
 0x846   : > { %v1327_v36 = vpop.f32.mrf.mxu3  ;;  %p2146_p0 = scmp.ne.s32.totalorder %s2144_s25, %s2145_s29  ;;  %p2151_p4 = scmp.lt.s32.totalorder %s2149_s3, %s2145_s29 }
 0x847   : > { %1370 = vrot.lane.b32.xlu1 %v1327_v36, %s2218_s19 }
 0x848   : > { %p2147_p1 = pnand %p2146_p0, %p2364_p5  ;;  %p2152_p7 = por %p2151_p4, %p2150_p3 }
 0x84a   : > { %p2148_p2 = pneg %p2147_p1 }
 0x84b   : > { %v1348_v37 = vpop.f32.mrf.mxu0 }
 0x84c   : > { %v1367_v38 = vpop.f32.mrf.mxu1  ;;  %v1310_v39 = vpop.f32.mrf.mxu2  ;;  %p2153_p8 = pnand %p2152_p7, %p2148_p2 }
 0x84e   : > { %v1329_v40 = vpop.f32.mrf.mxu3 }
 0x84f   : > { %1378 = vrot.lane.b32.xlu1 %v1365_v34, %s2219_s24  ;;  %s2686_s24 = sld [smem:[#allocation30_spill]] }
 0x89e   : > { %v1375_v45 = vpop.permute.xlu2 %1374 }
 0x8b9   : > { %v1371_v43 = vpop.permute.xlu1 %1370 }
 0x8ba   : > { %v1381_v44 = vsel %vm805_vm1, %v1308_v35, %v1371_v43 }
 0x8bb   : > { %v1382_v47 = vsel %vm1043_vm3, %v1381_v44, %v1375_v45 }
 0x8c1   : > { %v1379_v46 = vpop.permute.xlu1 %1378 }
 0x8c2   : > { %v1383_v48 = vsel %vm1045_vm4, %v1382_v47, %v1379_v46  ;;  %v1937_v46 = vld [vmem:[%s2686_s24] ss:$0 sm:$0xff] }
 0x8c3   : > { %v1384_v49 = vpack.c.bf16 %v1383_v48, %v1383_v48  ;;  %v1938_v48 = vld [vmem:[%s2690_s1] ss:$0 sm:$0xff] }
 0x8c5   : > { %1784 = vmatmul.msk.bf16.vlgmr.msra.gmra.mxu2 %vm763_vm0, %v1384_v49 }
 0x948   : > { %v1412_v51 = vpop.f32.mrf.mxu2 }
 0x949   : > { %v1413_v52 = vadd.f32 %v1932_v50, %v1412_v51 }
 0x94b   : > { %v1416_v53 = vadd.f32 %v1413_v52, %v2508_v17  ;;  %v1826_v17 = vld [vmem:[%s2639_s12 + $0x18] sm:$0xff] }
 0x94c   : > { %1532 = vmatpush.bf16.msrb.mxu0 %v1826_v17 }
 0x94d   : > { %v1419_v54 = vsel %vm763_vm0, %v1416_v53, 0.0 }
 0x94e   : > { %1420 = vadd.xlane.f32.xlu2 %v1419_v54 }
 0x950   : > { %v1414_v55 = vpop.f32.mrf.mxu2  ;;  %1533 = vmatpush.bf16.msrb.mxu0 %v1825_v1 }
 0x954   : > { %1534 = vmatpush.bf16.msrb.mxu0 %v1824_v18 }
 0x958   : > { %1535 = vmatpush.bf16.msrb.mxu0 %v1823_v19 }
 0x9c1   : > { %v1421_v56 = vpop.xlane.xlu2 %1420 }
 0x9c2   : > { %v1422_v57 = vmul.f32 %v1421_v56, %v2489_v58 }
 0x9c4   : > { %v1423_v59 = vsub.f32 %v1416_v53, %v1422_v57 }
 0x9c6   : > { %v1424_v60 = vmul.f32 %v1423_v59, %v1423_v59 }
 0x9c8   : > { %v1425_v61 = vsel %vm763_vm0, %v1424_v60, 0.0 }
 0x9c9   : > { %1426 = vadd.xlane.f32.xlu1 %v1425_v61 }
 0xa3c   : > { %v1427_v63 = vpop.xlane.xlu1 %1426 }
 0xa3d   : > { %v1428_v0 = vmul.f32 %v1427_v63, %v2489_v58 }
 0xa3f   : > { %v1429_v3 = vadd.f32 1e-05, %v1428_v0 }
 0xa41   : > { %1975 = vrsqrt.f32 %v1429_v3  ;;  %vm1436_vm10 = vweird.f32 %v1429_v3 }
 0xa47   : > { %v1976_v4 = vpop.eup %1975 }
 0xa48   : > { %v1431_v5 = vmul.f32 %v1976_v4, %v1429_v3  ;;  %vm1437_vm9 = vweird.f32 %v1976_v4 }
 0xa49   : > { %vm1438_vm11 = vmor %vm1436_vm10, %vm1437_vm9 }
 0xa4a   : > { %v1432_v6 = vmul.f32 %v1976_v4, %v1431_v5 }
 0xa4c   : > { %v1433_v7 = vmul.f32 0.5, %v1432_v6 }
 0xa4e   : > { %v1434_v8 = vsub.f32 1.5, %v1433_v7 }
 0xa50   : > { %v1435_v9 = vmul.f32 %v1976_v4, %v1434_v8 }
 0xa52   : > { %v1439_v11 = vsel %vm1438_vm11, %v1976_v4, %v1435_v9 }
 0xa53   : > { %v1440_v13 = vmul.f32 %v1439_v11, %v1423_v59 }
 0xa55   : > { %v1444_v14 = vmul.f32 %v1933_v10, %v1440_v13 }
 0xa57   : > { %v1448_v15 = vadd.f32 %v1934_v12, %v1444_v14 }
 0xa59   : > { %v1449_v16 = vpack.c.bf16 %v1448_v15, %v1448_v15 }
 0xa5b   : > { %1793 = vmatmul.msk.bf16.vlgmr.msra.gmra.mxu3 %vm763_vm0, %v1449_v16 }
 0xade   : > { %v1482_v21 = vpop.f32.mrf.mxu3 }
 0xadf   : > { %v1483_v22 = vadd.f32 %v1935_v20, %v1482_v21 }
 0xae1   : > { %v1486_v23 = vmax.f32 %v1483_v22, 0.0 }
 0xae3   : > { %v1487_v24 = vpack.c.bf16 %v1486_v23, %v1486_v23 }
 0xae5   : > { %1810 = vmatmul.msk.bf16.vlgmr.msrb.gmra.mxu0 %vm1524_vm12, %v1487_v24 }
 0xae6   : > { %v1484_v25 = vpop.f32.mrf.mxu3 }
 0xb62   : > { %v1537_v27 = vpop.f32.mrf.mxu0 }
 0xb63   : > { %v1538_v28 = vadd.f32 %v1936_v26, %v1537_v27 }
 0xb65   : > { %v1541_v29 = vadd.f32 %v1538_v28, %v1448_v15 }
 0xb67   : > { %v1544_v30 = vsel %vm763_vm0, %v1541_v29, 0.0 }
 0xb68   : > { %1545 = vadd.xlane.f32.xlu0 %v1544_v30 }
 0xb6a   : > { %v1539_v31 = vpop.f32.mrf.mxu0 }
 0xbdb   : > { %v1546_v32 = vpop.xlane.xlu0 %1545 }
 0xbdc   : > { %v1547_v33 = vmul.f32 %v1546_v32, %v2489_v58 }
 0xbde   : > { %v1548_v34 = vsub.f32 %v1541_v29, %v1547_v33 }
 0xbe0   : > { %v1549_v35 = vmul.f32 %v1548_v34, %v1548_v34 }
 0xbe2   : > { %v1550_v36 = vsel %vm763_vm0, %v1549_v35, 0.0 }
 0xbe3   : > { %1551 = vadd.xlane.f32.xlu0 %v1550_v36 }
 0xc56   : > { %v1552_v37 = vpop.xlane.xlu0 %1551 }
 0xc57   : > { %v1553_v38 = vmul.f32 %v1552_v37, %v2489_v58 }
 0xc59   : > { %v1554_v39 = vadd.f32 1e-05, %v1553_v38 }
 0xc5b   : > { %1977 = vrsqrt.f32 %v1554_v39  ;;  %vm1561_vm14 = vweird.f32 %v1554_v39 }
 0xc61   : > { %v1978_v40 = vpop.eup %1977 }
 0xc62   : > { %v1556_v41 = vmul.f32 %v1978_v40, %v1554_v39  ;;  %vm1562_vm13 = vweird.f32 %v1978_v40 }
 0xc63   : > { %vm1563_vm15 = vmor %vm1561_vm14, %vm1562_vm13 }
 0xc64   : > { %v1557_v42 = vmul.f32 %v1978_v40, %v1556_v41 }
 0xc66   : > { %v1558_v43 = vmul.f32 0.5, %v1557_v42 }
 0xc68   : > { %v1559_v44 = vsub.f32 1.5, %v1558_v43 }
 0xc6a   : > { %v1560_v45 = vmul.f32 %v1978_v40, %v1559_v44 }
 0xc6c   : > { %v1564_v58 = vsel %vm1563_vm15, %v1978_v40, %v1560_v45 }
 0xc6d   : > { %v1565_v47 = vmul.f32 %v1564_v58, %v1548_v34 }
 0xc6f   : > { %v1569_v49 = vmul.f32 %v1937_v46, %v1565_v47 }
 0xc71   : > { %v1573_v50 = vadd.f32 %v1938_v48, %v1569_v49 }
 0xc73   : > { %1574 = vst.msk [vmem:[%s727_s4] sm:$0xff] %vm763_vm0, %v1573_v50 }
 0xc74   : > { %2156 = shalt.err (!%p2153_p8)
}
 0xc75   : > { %1847 = dma.vmem_to_hbm [thread:$0]  (%p2364_p5), %s1589_s2, 128, %s1591_s8, %s1576_s18  }
 0xc76 PF: > { %s2691_s27 = sld [smem:[#allocation19_spill]] }
 0xc77   : > { %s2692_s23 = sld [smem:[#allocation16_spill]] }
 0xc7c   : > { %p1879_p9 = scmp.ge.s32.totalorder %s2691_s27, 2 }
 0xc7d   : > { %s1602_s28 = sand.u32 1, %s2692_s23  }
 0xc7e   : > { %p1866_p10 = pnand %p1879_p9, %p2368_p6  ;;  %s1603_s26 = scalar_lea.sflag [#allocation4], %s1602_s28 }
 0xc80   : > { %p1867_p11 = pneg %p1866_p10 }
 0xc82   : > { %2186 = dma.done.wait (%p1867_p11), %s1603_s26, 128  }
 0xc83   : > { %2188 = vsyncadd (%p1867_p11), %s1603_s26, 4294967168  ;;  %s2694_s24 = sld [smem:[#allocation20_spill]] }
 0xc84   : > { %s2695_s1 = sld [smem:[#allocation17_spill]] }
 0xc85   : > { %s2696_s22 = sld [smem:[#allocation18_spill]] }
 0xc86   : > { %s2697_s23 = sld [smem:[#allocation21_spill]] }
 0xc89   : > { %p33_p12 = scmp.ge.s32.totalorder %s2694_s24, 4  }
 0xc8b   :  { %35 = sbr.rel (!%p33_p12) target bundleno = 16 (0x10), region = 162 }
 0xc90   :  { %1609 = vsyncpa [#allocation3], 1 }
 0xc91   :  { %1611 = vsyncpa [#allocation3 + $0x1], 1 }
 0xc92   :  { %1612 = vsyncpa [#allocation6], 1 }
 0xc93   :  { %1613 = vsyncpa [#allocation9], 1 }
 0xc94   :  { %1614 = vsyncpa [#allocation4], 1 }
 0xc95   :  { %1616 = vsyncpa [#allocation4 + $0x1], 1 }

</bundles_post_ra>
